<compile_context>
chip_gen: v7x
topology: tpu7x:2x2x1
jax: 0.10.0
libtpu: 0.0.40
codegen_flags: <defaults>
</compile_context>

<pallas_src>
import functools

import jax
import jax.numpy as jnp
import numpy as np
from jax.experimental import pallas as pl
from jax.experimental.pallas import tpu as pltpu

EPS = 1e-5
# MXU-native operand dtype; accumulation is always f32 via preferred_element_type.
MATMUL_DTYPE = jnp.bfloat16


def _round_up(a, b):
    return -(-a // b) * b


@functools.lru_cache(maxsize=None)
def _vmem_limit_bytes():
    """Generation-aware VMEM budget: ~3/4 of physical, capped at 96 MiB
    (v5e/v6e: 128 MiB physical -> 96 MiB; v7x: 64 MiB -> 48 MiB)."""
    cap = None
    try:
        info = pltpu.get_tpu_info()
        cap = int(getattr(info, "vmem_capacity_bytes", 0)) or None
    except Exception:
        cap = None
    if cap is None:
        return 32 * 1024 * 1024  # conservative fallback, safe on every gen
    return int(min(96 * 1024 * 1024, max(32 * 1024 * 1024, cap * 3 // 4)))


def _row_tile(m, row_bytes, budget):
    """Largest multiple-of-8 divisor of m whose tile fits a per-buffer VMEM
    byte budget; falls back to the full extent (always a legal block dim).
    TODO(synk): cdiv-based grid with a masked tail for awkward m."""
    cap = max(8, budget // max(row_bytes, 1))
    best = 0
    t = 8
    while t <= m and t <= cap:
        if m % t == 0:
            best = t
        t += 8
    return best if best else m


def _col_mask(L, Wq, wo):
    """(L, 1) f32 mask of valid (non-garbage) columns, built in-kernel
    (iota + compare is free VPU filler; removes an HBM mask stream)."""
    col = jax.lax.broadcasted_iota(jnp.int32, (L, 1), 0)
    return ((col % Wq) < wo).astype(jnp.float32)


# ---------------------------------------------------------------------------
# Kernel A: conv1 (3 row-grouped matmuls, K=3*cin) + shortcut 1x1 + BN stats
# ---------------------------------------------------------------------------
def _make_conv1_shortcut_kernel(group_meta, sc_meta, L, Wq, wo, cout):
    def kernel(xp_ref, w1_ref, ws_ref, y1_ref, ys_ref, st_ref):
        m = _col_mask(L, Wq, wo)
        acc = jnp.zeros((L, cout), jnp.float32)
        for g, taps in enumerate(group_meta):        # 3 filter-row groups
            xcat = jnp.concatenate(
                [xp_ref[plane, start:start + L, :] for plane, start in taps],
                axis=-1)                             # (L, 3*cin), bf16, VMEM-local
            acc = acc + jnp.dot(xcat, w1_ref[g],
                                preferred_element_type=jnp.float32)
        sp, ss = sc_meta                             # 1x1 shortcut conv
        ysv = jnp.dot(xp_ref[sp, ss:ss + L, :], ws_ref[...],
                      preferred_element_type=jnp.float32)

        # TODO(synk): lane-dense pack acc/ysv to (L/k, k*cout) before storing
        # when cout < 128 and (128//cout) | L to get unmasked full-lane vst.
        y1_ref[...] = acc
        ys_ref[...] = ysv

        # Fused BN statistics: one masked temporary per stream.
        t1 = acc * m
        st_ref[0:1, :] = jnp.sum(t1, axis=0, keepdims=True)
        st_ref[1:2, :] = jnp.sum(t1 * acc, axis=0, keepdims=True)
        ts = ysv * m
        st_ref[2:3, :] = jnp.sum(ts, axis=0, keepdims=True)
        st_ref[3:4, :] = jnp.sum(ts * ysv, axis=0, keepdims=True)

    return kernel


def _conv1_shortcut_call(xplanes, w1_groups, ws_mat, group_meta, sc_meta,
                         L, Wq, wo):
    N, n_planes, P, cin = xplanes.shape
    cout = w1_groups.shape[-1]
    kernel = _make_conv1_shortcut_kernel(group_meta, sc_meta, L, Wq, wo, cout)
    return pl.pallas_call(
        kernel,
        out_shape=(jax.ShapeDtypeStruct((N, L, cout), jnp.float32),
                   jax.ShapeDtypeStruct((N, L, cout), jnp.float32),
                   jax.ShapeDtypeStruct((N, 4, cout), jnp.float32)),
        grid_spec=pltpu.PrefetchScalarGridSpec(
            num_scalar_prefetch=0,
            grid=(N,),
            in_specs=[
                pl.BlockSpec((None, n_planes, P, cin), lambda n: (n, 0, 0, 0)),
                pl.BlockSpec((3, 3 * cin, cout), lambda n: (0, 0, 0)),
                pl.BlockSpec((cin, cout), lambda n: (0, 0)),
            ],
            out_specs=(
                pl.BlockSpec((None, L, cout), lambda n: (n, 0, 0)),
                pl.BlockSpec((None, L, cout), lambda n: (n, 0, 0)),
                pl.BlockSpec((None, 4, cout), lambda n: (n, 0, 0)),
            ),
        ),
        compiler_params=pltpu.CompilerParams(
            dimension_semantics=("parallel",),
            vmem_limit_bytes=_vmem_limit_bytes()),
    )(xplanes, w1_groups, ws_mat)


# ---------------------------------------------------------------------------
# Kernel B: bn1+relu into bf16 halo scratch, conv2 (3 matmuls, K=3*cout) + stats
# ---------------------------------------------------------------------------
def _make_conv2_kernel(group_starts, L, F, R1, Wq, wo, cout):
    def kernel(y1_ref, s1_ref, b1_ref, w2_ref, y2_ref, st_ref, o1_buf):
        m = _col_mask(L, Wq, wo)
        # Zero only the halo rows; the valid rows are fully overwritten below.
        o1_buf[0:F, :] = jnp.zeros((F, cout), MATMUL_DTYPE)
        o1_buf[F + L:R1, :] = jnp.zeros((R1 - F - L, cout), MATMUL_DTYPE)
        # bn1 + relu + column mask in f32; cast to bf16 ONCE into the scratch.
        o1 = jnp.maximum(y1_ref[...] * s1_ref[...] + b1_ref[...], 0.0) * m
        o1_buf[F:F + L, :] = o1.astype(MATMUL_DTYPE)

        acc = jnp.zeros((L, cout), jnp.float32)
        for g, starts in enumerate(group_starts):    # 3 filter-row groups
            xcat = jnp.concatenate(
                [o1_buf[st:st + L, :] for st in starts], axis=-1)
            acc = acc + jnp.dot(xcat, w2_ref[g],
                                preferred_element_type=jnp.float32)
        y2_ref[...] = acc
        t = acc * m
        st_ref[0:1, :] = jnp.sum(t, axis=0, keepdims=True)
        st_ref[1:2, :] = jnp.sum(t * acc, axis=0, keepdims=True)

    return kernel


def _conv2_call(y1, scale1, bias1, w2_groups, group_starts, L, F, R1, Wq, wo):
    N, _, cout = y1.shape
    kernel = _make_conv2_kernel(group_starts, L, F, R1, Wq, wo, cout)
    return pl.pallas_call(
        kernel,
        out_shape=(jax.ShapeDtypeStruct((N, L, cout), jnp.float32),
                   jax.ShapeDtypeStruct((N, 2, cout), jnp.float32)),
        grid_spec=pltpu.PrefetchScalarGridSpec(
            num_scalar_prefetch=0,
            grid=(N,),
            in_specs=[
                pl.BlockSpec((None, L, cout), lambda n: (n, 0, 0)),
                pl.BlockSpec((1, cout), lambda n: (0, 0)),
                pl.BlockSpec((1, cout), lambda n: (0, 0)),
                pl.BlockSpec((3, 3 * cout, cout), lambda n: (0, 0, 0)),
            ],
            out_specs=(
                pl.BlockSpec((None, L, cout), lambda n: (n, 0, 0)),
                pl.BlockSpec((None, 2, cout), lambda n: (n, 0, 0)),
            ),
            scratch_shapes=[pltpu.VMEM((R1, cout), MATMUL_DTYPE)],
        ),
        compiler_params=pltpu.CompilerParams(
            dimension_semantics=("parallel",),
            vmem_limit_bytes=_vmem_limit_bytes()),
    )(y1, scale1, bias1, w2_groups)


# ---------------------------------------------------------------------------
# Kernel C: fused bn2 + bn_shortcut + add + relu (lane-dense packed)
# ---------------------------------------------------------------------------
def _fused_bn_add_relu_kernel(y2_ref, ys_ref, s2_ref, ss_ref, b_ref, o_ref):
    o_ref[...] = jnp.maximum(
        y2_ref[...] * s2_ref[...] + ys_ref[...] * ss_ref[...] + b_ref[...],
        0.0)


def _fused_output_call(y2, ys, scale2, bias2, scale_s, bias_s):
    m, c = y2.shape
    # Lane-dense packing: view (m, c) as (m/k, k*c) with k*c a multiple of 128
    # so stores are unmasked full-lane vst; scale/bias are tiled to match.
    k = 1
    if c < 128 and 128 % c == 0 and m % (128 // c) == 0:
        k = 128 // c
    mp, cp = m // k, k * c
    y2p, ysp = y2.reshape(mp, cp), ys.reshape(mp, cp)
    s2p = jnp.tile(scale2, (1, k))
    ssp = jnp.tile(scale_s, (1, k))
    bp = jnp.tile(bias2 + bias_s, (1, k))            # biases pre-added in glue
    vmem = _vmem_limit_bytes()
    tr = _row_tile(mp, row_bytes=3 * cp * 4, budget=max(4 << 20, vmem // 8))
    out = pl.pallas_call(
        _fused_bn_add_relu_kernel,
        out_shape=jax.ShapeDtypeStruct((mp, cp), jnp.float32),
        grid_spec=pltpu.PrefetchScalarGridSpec(
            num_scalar_prefetch=0,
            grid=(mp // tr,),
            in_specs=[pl.BlockSpec((tr, cp), lambda i: (i, 0)),
                      pl.BlockSpec((tr, cp), lambda i: (i, 0)),
                      pl.BlockSpec((1, cp), lambda i: (0, 0)),
                      pl.BlockSpec((1, cp), lambda i: (0, 0)),
                      pl.BlockSpec((1, cp), lambda i: (0, 0))],
            out_specs=pl.BlockSpec((tr, cp), lambda i: (i, 0)),
        ),
        compiler_params=pltpu.CompilerParams(
            dimension_semantics=("parallel",),
            vmem_limit_bytes=vmem),
    )(y2p, ysp, s2p, ssp, bp)
    return out.reshape(m, c)


# ---------------------------------------------------------------------------
# Forward pass (glue: layout permutations + tiny (1, C) BN coefficient math)
# ---------------------------------------------------------------------------
def basic_block_forward(x_nchw, params, stride):
    s = int(stride)
    x = jnp.transpose(x_nchw, (0, 2, 3, 1)).astype(jnp.float32)  # NCHW -> NHWC
    N, H, W, cin = x.shape
    cout = params["w1"].shape[0]

    ho = (H + 2 - 3) // s + 1
    wo = (W + 2 - 3) // s + 1
    Hp = _round_up(H + 2, s)
    Wp = _round_up(W + 2, s)
    Hq, Wq = Hp // s, Wp // s
    L = ho * Wq                       # rows of the "Wq-wide" activation layout
    F = _round_up(Wq + 1, 8)          # aligned front zero-halo for conv2
    R1 = F + L + Wq + 1               # haloed conv2 input rows (VMEM-only now)

    # ---- glue: parity (space-to-depth) split of the padded input, bf16 -----
    xp = jnp.pad(x, ((0, 0), (1, Hp - H - 1), (1, Wp - W - 1), (0, 0)))
    planes = [xp[:, p::s, q::s, :].reshape(N, Hq * Wq, cin)
              for p in range(s) for q in range(s)]
    xplanes = jnp.stack(planes, axis=1).astype(MATMUL_DTYPE)   # cast ONCE

    # Per-tap (parity-plane, window-start) metadata, grouped per filter row.
    tap_meta = [((kh % s) * s + (kw % s), (kh // s) * Wq + (kw // s))
                for kh in range(3) for kw in range(3)]
    group_meta = tuple(tuple(tap_meta[3 * kh:3 * kh + 3]) for kh in range(3))
    sc_meta = ((1 % s) * s + (1 % s), (1 // s) * Wq + (1 // s))
    P = max([Hq * Wq] + [st + L for _, st in tap_meta] + [sc_meta[1] + L])
    if P > Hq * Wq:
        xplanes = jnp.pad(xplanes, ((0, 0), (0, 0), (0, P - Hq * Wq), (0, 0)))

    # ---- weights regrouped per filter row: (3, 3*C, cout), bf16 -------------
    def row_groups(w):
        return jnp.stack(
            [jnp.concatenate([w[:, :, kh, kw].T for kw in range(3)], axis=0)
             for kh in range(3)], axis=0).astype(MATMUL_DTYPE)

    w1_groups = row_groups(params["w1"])
    w2_groups = row_groups(params["w2"])
    ws_mat = params["ws"][:, :, 0, 0].T.astype(MATMUL_DTYPE)

    # ---- kernel A: conv1 + shortcut 1x1 + fused stats ----------------------
    y1, ys, stats_a = _conv1_shortcut_call(
        xplanes, w1_groups, ws_mat, group_meta, sc_meta, L, Wq, wo)

    count = float(N * ho * wo)

    def bn_coeffs(ssum, ssq, gamma, beta):
        mean = ssum / count
        var = jnp.maximum(ssq / count - mean * mean, 0.0)  # clamp: NaN-safe
        scale = gamma / jnp.sqrt(var + EPS)
        bias = beta - mean * scale
        return scale.reshape(1, -1), bias.reshape(1, -1)

    sa = jnp.sum(stats_a, axis=0)                                  # (4, cout)
    scale1, bias1 = bn_coeffs(sa[0], sa[1], params["g1"], params["b1"])
    scale_s, bias_s = bn_coeffs(sa[2], sa[3], params["gs"], params["bs"])

    # ---- kernel B: bn1+relu into bf16 scratch, conv2 + fused stats ----------
    base = F - Wq - 1
    group_starts = tuple(tuple(base + kh * Wq + kw for kw in range(3))
                         for kh in range(3))
    y2, stats_b = _conv2_call(y1, scale1, bias1, w2_groups, group_starts,
                              L, F, R1, Wq, wo)
    sb = jnp.sum(stats_b, axis=0)
    scale2, bias2 = bn_coeffs(sb[0], sb[1], params["g2"], params["b2"])

    # ---- kernel C: fused bn2 + bn_shortcut + add + relu ---------------------
    out_flat = _fused_output_call(y2.reshape(N * L, cout),
                                  ys.reshape(N * L, cout),
                                  scale2, bias2, scale_s, bias_s)
    out = out_flat.reshape(N, ho, Wq, cout)[:, :, :wo, :]
    return jnp.transpose(out, (0, 3, 1, 2))                        # -> NCHW


# ---------------------------------------------------------------------------
# Parameter init + pure-JAX reference (training-mode BN, matches PyTorch)
# ---------------------------------------------------------------------------
def init_basic_block(key, in_c, out_c):
    k1, k2, k3 = jax.random.split(key, 3)

    def uinit(k, shape, fan_in):
        bound = float(np.sqrt(1.0 / fan_in))
        return jax.random.uniform(k, shape, jnp.float32, -bound, bound)

    return dict(
        w1=uinit(k1, (out_c, in_c, 3, 3), in_c * 9),
        g1=jnp.ones((out_c,), jnp.float32), b1=jnp.zeros((out_c,), jnp.float32),
        w2=uinit(k2, (out_c, out_c, 3, 3), out_c * 9),
        g2=jnp.ones((out_c,), jnp.float32), b2=jnp.zeros((out_c,), jnp.float32),
        ws=uinit(k3, (out_c, in_c, 1, 1), in_c),
        gs=jnp.ones((out_c,), jnp.float32), bs=jnp.zeros((out_c,), jnp.float32),
    )


def ref_forward(x, p, stride):
    def conv(x, w, s, pad):
        return jax.lax.conv_general_dilated(
            x, w, (s, s), ((pad, pad), (pad, pad)),
            dimension_numbers=("NCHW", "OIHW", "NCHW"))

    def bn(y, g, b):
        mean = jnp.mean(y, axis=(0, 2, 3), keepdims=True)
        var = jnp.var(y, axis=(0, 2, 3), keepdims=True)
        return ((y - mean) / jnp.sqrt(var + EPS) * g.reshape(1, -1, 1, 1)
                + b.reshape(1, -1, 1, 1))

    out = jax.nn.relu(bn(conv(x, p["w1"], stride, 1), p["g1"], p["b1"]))
    out = bn(conv(out, p["w2"], 1, 1), p["g2"], p["b2"])
    sc = bn(conv(x, p["ws"], stride, 0), p["gs"], p["bs"])
    return jax.nn.relu(out + sc)


if __name__ == "__main__":
    key = jax.random.PRNGKey(0)
    kx, kp = jax.random.split(key)

    N, C_IN, C_OUT, H, W, STRIDE = 2, 4, 8, 16, 16, 2
    x = jax.random.normal(kx, (N, C_IN, H, W), dtype=jnp.float32)
    params = init_basic_block(kp, C_IN, C_OUT)

    fwd = jax.jit(functools.partial(basic_block_forward, stride=STRIDE))
    out = jax.block_until_ready(fwd(x, params))

    ref = jax.block_until_ready(ref_forward(x, params, STRIDE))
    # bf16 MXU operands (f32 accumulation) vs. a pure-f32 reference: tolerance
    # loosened accordingly (bugs show up as O(1) errors, bf16 noise as <5e-2).
    np.testing.assert_allclose(np.asarray(out), np.asarray(ref),
                               rtol=5e-2, atol=5e-2)

    print("KERNEL_OK")
</pallas_src>

<mosaic_0001>
module attributes {stable_mosaic.version = 11 : i64} {
  func.func @kernel(%arg0: i32, %arg1: memref<1x4x82x4xbf16, #tpu.memory_space<vmem>>, %arg2: memref<3x12x8xbf16, #tpu.memory_space<vmem>>, %arg3: memref<4x8xbf16, #tpu.memory_space<vmem>>, %arg4: memref<1x72x8xf32, #tpu.memory_space<vmem>>, %arg5: memref<1x72x8xf32, #tpu.memory_space<vmem>>, %arg6: memref<1x4x8xf32, #tpu.memory_space<vmem>>) attributes {dimension_semantics = [#tpu.dimension_semantics<parallel>], iteration_bounds = array<i64: 2>, scalar_prefetch = 0 : i64, scratch_operands = 0 : i64, tpu.core_type = #tpu.core_type<tc>, window_params = [{transform_indices = @transform_0, window_bounds = array<i64: 1, 4, 82, 4>}, {pipeline_mode = #tpu.pipeline_mode<synchronous>, transform_indices = @transform_1, window_bounds = array<i64: 3, 12, 8>}, {pipeline_mode = #tpu.pipeline_mode<synchronous>, transform_indices = @transform_2, window_bounds = array<i64: 4, 8>}, {transform_indices = @transform_3, window_bounds = array<i64: 1, 72, 8>}, {transform_indices = @transform_4, window_bounds = array<i64: 1, 72, 8>}, {transform_indices = @transform_5, window_bounds = array<i64: 1, 4, 8>}]} {
    %0 = tpu.iota {dimensions = array<i32: 0>} : vector<72x1xi32>
    %c9_i32 = arith.constant 9 : i32
    %c0_i32 = arith.constant 0 : i32
    %1 = arith.cmpi eq, %c9_i32, %c0_i32 : i32
    %c1_i32 = arith.constant 1 : i32
    %2 = arith.select %1, %c1_i32, %c9_i32 : i32
    %3 = vector.broadcast %2 : i32 to vector<72x1xi32>
    %4 = arith.remsi %0, %3 : vector<72x1xi32>
    %c0_i32_0 = arith.constant 0 : i32
    %5 = vector.broadcast %c0_i32_0 : i32 to vector<72x1xi32>
    %6 = arith.cmpi ne, %4, %5 : vector<72x1xi32>
    %c0_i32_1 = arith.constant 0 : i32
    %7 = vector.broadcast %c0_i32_1 : i32 to vector<72x1xi32>
    %8 = arith.cmpi slt, %4, %7 : vector<72x1xi32>
    %c0_i32_2 = arith.constant 0 : i32
    %9 = arith.cmpi slt, %2, %c0_i32_2 : i32
    %10 = vector.broadcast %9 : i1 to vector<72x1xi1>
    %11 = vector.broadcast %10 : vector<72x1xi1> to vector<72x1xi1>
    %12 = arith.xori %8, %11 : vector<72x1xi1>
    %13 = arith.andi %12, %6 : vector<72x1xi1>
    %14 = vector.broadcast %2 : i32 to vector<72x1xi32>
    %15 = arith.addi %4, %14 : vector<72x1xi32>
    %16 = arith.select %13, %15, %4 : vector<72x1xi1>, vector<72x1xi32>
    %c8_i32 = arith.constant 8 : i32
    %17 = vector.broadcast %c8_i32 : i32 to vector<72x1xi32>
    %18 = arith.cmpi slt, %16, %17 : vector<72x1xi32>
    %19 = arith.extui %18 : vector<72x1xi1> to vector<72x1xi32>
    %20 = arith.sitofp %19 : vector<72x1xi32> to vector<72x1xf32>
    %cst = arith.constant 0.000000e+00 : f32
    %21 = vector.broadcast %cst : f32 to vector<72x8xf32>
    %c0 = arith.constant 0 : index
    %c0_3 = arith.constant 0 : index
    %c0_4 = arith.constant 0 : index
    %c0_5 = arith.constant 0 : index
    %22 = vector.load %arg1[%c0, %c0_3, %c0_4, %c0_5] : memref<1x4x82x4xbf16, #tpu.memory_space<vmem>>, vector<1x1x72x4xbf16>
    %23 = vector.shape_cast %22 : vector<1x1x72x4xbf16> to vector<72x4xbf16>
    %c0_6 = arith.constant 0 : index
    %c1 = arith.constant 1 : index
    %c0_7 = arith.constant 0 : index
    %c0_8 = arith.constant 0 : index
    %24 = vector.load %arg1[%c0_6, %c1, %c0_7, %c0_8] : memref<1x4x82x4xbf16, #tpu.memory_space<vmem>>, vector<1x1x72x4xbf16>
    %25 = vector.shape_cast %24 : vector<1x1x72x4xbf16> to vector<72x4xbf16>
    %c0_9 = arith.constant 0 : index
    %c0_10 = arith.constant 0 : index
    %c1_11 = arith.constant 1 : index
    %c0_12 = arith.constant 0 : index
    %26 = vector.load %arg1[%c0_9, %c0_10, %c1_11, %c0_12] : memref<1x4x82x4xbf16, #tpu.memory_space<vmem>>, vector<1x1x72x4xbf16>
    %27 = vector.shape_cast %26 : vector<1x1x72x4xbf16> to vector<72x4xbf16>
    %28 = tpu.concatenate %23, %25, %27 in 1 : vector<72x4xbf16>, vector<72x4xbf16>, vector<72x4xbf16> -> vector<72x12xbf16>
    %c0_13 = arith.constant 0 : index
    %c0_14 = arith.constant 0 : index
    %c0_15 = arith.constant 0 : index
    %29 = vector.load %arg2[%c0_13, %c0_14, %c0_15] : memref<3x12x8xbf16, #tpu.memory_space<vmem>>, vector<1x12x8xbf16>
    %30 = vector.shape_cast %29 : vector<1x12x8xbf16> to vector<12x8xbf16>
    %cst_16 = arith.constant dense<0.000000e+00> : vector<72x8xf32>
    %31 = tpu.matmul %28, %30, %cst_16 {dimension_numbers = #tpu.dot_dimension_numbers<[1], [0], [0], [1], [0, 0, 1, 1], [], []>} : vector<72x12xbf16>, vector<12x8xbf16>, vector<72x8xf32> -> vector<72x8xf32>
    %32 = arith.addf %21, %31 : vector<72x8xf32>
    %c0_17 = arith.constant 0 : index
    %c2 = arith.constant 2 : index
    %c0_18 = arith.constant 0 : index
    %c0_19 = arith.constant 0 : index
    %33 = vector.load %arg1[%c0_17, %c2, %c0_18, %c0_19] : memref<1x4x82x4xbf16, #tpu.memory_space<vmem>>, vector<1x1x72x4xbf16>
    %34 = vector.shape_cast %33 : vector<1x1x72x4xbf16> to vector<72x4xbf16>
    %c0_20 = arith.constant 0 : index
    %c3 = arith.constant 3 : index
    %c0_21 = arith.constant 0 : index
    %c0_22 = arith.constant 0 : index
    %35 = vector.load %arg1[%c0_20, %c3, %c0_21, %c0_22] : memref<1x4x82x4xbf16, #tpu.memory_space<vmem>>, vector<1x1x72x4xbf16>
    %36 = vector.shape_cast %35 : vector<1x1x72x4xbf16> to vector<72x4xbf16>
    %c0_23 = arith.constant 0 : index
    %c2_24 = arith.constant 2 : index
    %c1_25 = arith.constant 1 : index
    %c0_26 = arith.constant 0 : index
    %37 = vector.load %arg1[%c0_23, %c2_24, %c1_25, %c0_26] : memref<1x4x82x4xbf16, #tpu.memory_space<vmem>>, vector<1x1x72x4xbf16>
    %38 = vector.shape_cast %37 : vector<1x1x72x4xbf16> to vector<72x4xbf16>
    %39 = tpu.concatenate %34, %36, %38 in 1 : vector<72x4xbf16>, vector<72x4xbf16>, vector<72x4xbf16> -> vector<72x12xbf16>
    %c1_27 = arith.constant 1 : index
    %c0_28 = arith.constant 0 : index
    %c0_29 = arith.constant 0 : index
    %40 = vector.load %arg2[%c1_27, %c0_28, %c0_29] : memref<3x12x8xbf16, #tpu.memory_space<vmem>>, vector<1x12x8xbf16>
    %41 = vector.shape_cast %40 : vector<1x12x8xbf16> to vector<12x8xbf16>
    %cst_30 = arith.constant dense<0.000000e+00> : vector<72x8xf32>
    %42 = tpu.matmul %39, %41, %cst_30 {dimension_numbers = #tpu.dot_dimension_numbers<[1], [0], [0], [1], [0, 0, 1, 1], [], []>} : vector<72x12xbf16>, vector<12x8xbf16>, vector<72x8xf32> -> vector<72x8xf32>
    %43 = arith.addf %32, %42 : vector<72x8xf32>
    %c0_31 = arith.constant 0 : index
    %c0_32 = arith.constant 0 : index
    %c9 = arith.constant 9 : index
    %c0_33 = arith.constant 0 : index
    %44 = vector.load %arg1[%c0_31, %c0_32, %c9, %c0_33] : memref<1x4x82x4xbf16, #tpu.memory_space<vmem>>, vector<1x1x72x4xbf16>
    %45 = vector.shape_cast %44 : vector<1x1x72x4xbf16> to vector<72x4xbf16>
    %c0_34 = arith.constant 0 : index
    %c1_35 = arith.constant 1 : index
    %c9_36 = arith.constant 9 : index
    %c0_37 = arith.constant 0 : index
    %46 = vector.load %arg1[%c0_34, %c1_35, %c9_36, %c0_37] : memref<1x4x82x4xbf16, #tpu.memory_space<vmem>>, vector<1x1x72x4xbf16>
    %47 = vector.shape_cast %46 : vector<1x1x72x4xbf16> to vector<72x4xbf16>
    %c0_38 = arith.constant 0 : index
    %c0_39 = arith.constant 0 : index
    %c10 = arith.constant 10 : index
    %c0_40 = arith.constant 0 : index
    %48 = vector.load %arg1[%c0_38, %c0_39, %c10, %c0_40] : memref<1x4x82x4xbf16, #tpu.memory_space<vmem>>, vector<1x1x72x4xbf16>
    %49 = vector.shape_cast %48 : vector<1x1x72x4xbf16> to vector<72x4xbf16>
    %50 = tpu.concatenate %45, %47, %49 in 1 : vector<72x4xbf16>, vector<72x4xbf16>, vector<72x4xbf16> -> vector<72x12xbf16>
    %c2_41 = arith.constant 2 : index
    %c0_42 = arith.constant 0 : index
    %c0_43 = arith.constant 0 : index
    %51 = vector.load %arg2[%c2_41, %c0_42, %c0_43] : memref<3x12x8xbf16, #tpu.memory_space<vmem>>, vector<1x12x8xbf16>
    %52 = vector.shape_cast %51 : vector<1x12x8xbf16> to vector<12x8xbf16>
    %cst_44 = arith.constant dense<0.000000e+00> : vector<72x8xf32>
    %53 = tpu.matmul %50, %52, %cst_44 {dimension_numbers = #tpu.dot_dimension_numbers<[1], [0], [0], [1], [0, 0, 1, 1], [], []>} : vector<72x12xbf16>, vector<12x8xbf16>, vector<72x8xf32> -> vector<72x8xf32>
    %54 = arith.addf %43, %53 : vector<72x8xf32>
    %c0_45 = arith.constant 0 : index
    %c3_46 = arith.constant 3 : index
    %c0_47 = arith.constant 0 : index
    %c0_48 = arith.constant 0 : index
    %55 = vector.load %arg1[%c0_45, %c3_46, %c0_47, %c0_48] : memref<1x4x82x4xbf16, #tpu.memory_space<vmem>>, vector<1x1x72x4xbf16>
    %56 = vector.shape_cast %55 : vector<1x1x72x4xbf16> to vector<72x4xbf16>
    %c0_49 = arith.constant 0 : index
    %c0_50 = arith.constant 0 : index
    %57 = vector.load %arg3[%c0_49, %c0_50] : memref<4x8xbf16, #tpu.memory_space<vmem>>, vector<4x8xbf16>
    %cst_51 = arith.constant dense<0.000000e+00> : vector<72x8xf32>
    %58 = tpu.matmul %56, %57, %cst_51 {dimension_numbers = #tpu.dot_dimension_numbers<[1], [0], [0], [1], [0, 0, 1, 1], [], []>} : vector<72x4xbf16>, vector<4x8xbf16>, vector<72x8xf32> -> vector<72x8xf32>
    %c0_52 = arith.constant 0 : index
    %c0_53 = arith.constant 0 : index
    %c0_54 = arith.constant 0 : index
    %59 = vector.load %arg4[%c0_52, %c0_53, %c0_54] : memref<1x72x8xf32, #tpu.memory_space<vmem>>, vector<1x72x8xf32>
    %60 = vector.shape_cast %59 : vector<1x72x8xf32> to vector<72x8xf32>
    %61 = vector.shape_cast %54 : vector<72x8xf32> to vector<1x72x8xf32>
    tpu.vector_store %arg4[%c0_52, %c0_53, %c0_54], %61 {strides = array<i32>} : memref<1x72x8xf32, #tpu.memory_space<vmem>>, vector<1x72x8xf32>,
    %c0_55 = arith.constant 0 : index
    %c0_56 = arith.constant 0 : index
    %c0_57 = arith.constant 0 : index
    %62 = vector.load %arg5[%c0_55, %c0_56, %c0_57] : memref<1x72x8xf32, #tpu.memory_space<vmem>>, vector<1x72x8xf32>
    %63 = vector.shape_cast %62 : vector<1x72x8xf32> to vector<72x8xf32>
    %64 = vector.shape_cast %58 : vector<72x8xf32> to vector<1x72x8xf32>
    tpu.vector_store %arg5[%c0_55, %c0_56, %c0_57], %64 {strides = array<i32>} : memref<1x72x8xf32, #tpu.memory_space<vmem>>, vector<1x72x8xf32>,
    %65 = vector.broadcast %20 : vector<72x1xf32> to vector<72x8xf32>
    %66 = arith.mulf %54, %65 : vector<72x8xf32>
    %cst_58 = arith.constant dense<0.000000e+00> : vector<8xf32>
    %67 = vector.multi_reduction <add>, %66, %cst_58 [0] : vector<72x8xf32> to vector<8xf32>
    %68 = vector.shape_cast %67 : vector<8xf32> to vector<1x8xf32>
    %c0_59 = arith.constant 0 : index
    %c0_60 = arith.constant 0 : index
    %c0_61 = arith.constant 0 : index
    %69 = vector.load %arg6[%c0_59, %c0_60, %c0_61] : memref<1x4x8xf32, #tpu.memory_space<vmem>>, vector<1x1x8xf32>
    %70 = vector.shape_cast %69 : vector<1x1x8xf32> to vector<1x8xf32>
    %71 = vector.shape_cast %68 : vector<1x8xf32> to vector<1x1x8xf32>
    tpu.vector_store %arg6[%c0_59, %c0_60, %c0_61], %71 {strides = array<i32>} : memref<1x4x8xf32, #tpu.memory_space<vmem>>, vector<1x1x8xf32>,
    %72 = arith.mulf %66, %54 : vector<72x8xf32>
    %cst_62 = arith.constant dense<0.000000e+00> : vector<8xf32>
    %73 = vector.multi_reduction <add>, %72, %cst_62 [0] : vector<72x8xf32> to vector<8xf32>
    %74 = vector.shape_cast %73 : vector<8xf32> to vector<1x8xf32>
    %c0_63 = arith.constant 0 : index
    %c1_64 = arith.constant 1 : index
    %c0_65 = arith.constant 0 : index
    %75 = vector.load %arg6[%c0_63, %c1_64, %c0_65] : memref<1x4x8xf32, #tpu.memory_space<vmem>>, vector<1x1x8xf32>
    %76 = vector.shape_cast %75 : vector<1x1x8xf32> to vector<1x8xf32>
    %77 = vector.shape_cast %74 : vector<1x8xf32> to vector<1x1x8xf32>
    tpu.vector_store %arg6[%c0_63, %c1_64, %c0_65], %77 {strides = array<i32>} : memref<1x4x8xf32, #tpu.memory_space<vmem>>, vector<1x1x8xf32>,
    %78 = vector.broadcast %20 : vector<72x1xf32> to vector<72x8xf32>
    %79 = arith.mulf %58, %78 : vector<72x8xf32>
    %cst_66 = arith.constant dense<0.000000e+00> : vector<8xf32>
    %80 = vector.multi_reduction <add>, %79, %cst_66 [0] : vector<72x8xf32> to vector<8xf32>
    %81 = vector.shape_cast %80 : vector<8xf32> to vector<1x8xf32>
    %c0_67 = arith.constant 0 : index
    %c2_68 = arith.constant 2 : index
    %c0_69 = arith.constant 0 : index
    %82 = vector.load %arg6[%c0_67, %c2_68, %c0_69] : memref<1x4x8xf32, #tpu.memory_space<vmem>>, vector<1x1x8xf32>
    %83 = vector.shape_cast %82 : vector<1x1x8xf32> to vector<1x8xf32>
    %84 = vector.shape_cast %81 : vector<1x8xf32> to vector<1x1x8xf32>
    tpu.vector_store %arg6[%c0_67, %c2_68, %c0_69], %84 {strides = array<i32>} : memref<1x4x8xf32, #tpu.memory_space<vmem>>, vector<1x1x8xf32>,
    %85 = arith.mulf %79, %58 : vector<72x8xf32>
    %cst_70 = arith.constant dense<0.000000e+00> : vector<8xf32>
    %86 = vector.multi_reduction <add>, %85, %cst_70 [0] : vector<72x8xf32> to vector<8xf32>
    %87 = vector.shape_cast %86 : vector<8xf32> to vector<1x8xf32>
    %c0_71 = arith.constant 0 : index
    %c3_72 = arith.constant 3 : index
    %c0_73 = arith.constant 0 : index
    %88 = vector.load %arg6[%c0_71, %c3_72, %c0_73] : memref<1x4x8xf32, #tpu.memory_space<vmem>>, vector<1x1x8xf32>
    %89 = vector.shape_cast %88 : vector<1x1x8xf32> to vector<1x8xf32>
    %90 = vector.shape_cast %87 : vector<1x8xf32> to vector<1x1x8xf32>
    tpu.vector_store %arg6[%c0_71, %c3_72, %c0_73], %90 {strides = array<i32>} : memref<1x4x8xf32, #tpu.memory_space<vmem>>, vector<1x1x8xf32>,
    return
  }
  func.func @transform_0(%arg0: i32) -> (i32, i32, i32, i32) {
    %c0_i32 = arith.constant 0 : i32
    %c0_i32_0 = arith.constant 0 : i32
    %c0_i32_1 = arith.constant 0 : i32
    %c0_i32_2 = arith.constant 0 : i32
    return %arg0, %c0_i32, %c0_i32_0, %c0_i32_1 : i32, i32, i32, i32
  }
  func.func @transform_1(%arg0: i32) -> (i32, i32, i32) {
    %c0_i32 = arith.constant 0 : i32
    %c0_i32_0 = arith.constant 0 : i32
    %c0_i32_1 = arith.constant 0 : i32
    %c0_i32_2 = arith.constant 0 : i32
    return %c0_i32, %c0_i32_0, %c0_i32_1 : i32, i32, i32
  }
  func.func @transform_2(%arg0: i32) -> (i32, i32) {
    %c0_i32 = arith.constant 0 : i32
    %c0_i32_0 = arith.constant 0 : i32
    %c0_i32_1 = arith.constant 0 : i32
    return %c0_i32, %c0_i32_0 : i32, i32
  }
  func.func @transform_3(%arg0: i32) -> (i32, i32, i32) {
    %c0_i32 = arith.constant 0 : i32
    %c0_i32_0 = arith.constant 0 : i32
    %c0_i32_1 = arith.constant 0 : i32
    return %arg0, %c0_i32, %c0_i32_0 : i32, i32, i32
  }
  func.func @transform_4(%arg0: i32) -> (i32, i32, i32) {
    %c0_i32 = arith.constant 0 : i32
    %c0_i32_0 = arith.constant 0 : i32
    %c0_i32_1 = arith.constant 0 : i32
    return %arg0, %c0_i32, %c0_i32_0 : i32, i32, i32
  }
  func.func @transform_5(%arg0: i32) -> (i32, i32, i32) {
    %c0_i32 = arith.constant 0 : i32
    %c0_i32_0 = arith.constant 0 : i32
    %c0_i32_1 = arith.constant 0 : i32
    return %arg0, %c0_i32, %c0_i32_0 : i32, i32, i32
  }
}

module attributes {stable_mosaic.version = 11 : i64} {
  func.func @kernel(%arg0: i32, %arg1: memref<1x72x8xf32, #tpu.memory_space<vmem>>, %arg2: memref<1x8xf32, #tpu.memory_space<vmem>>, %arg3: memref<1x8xf32, #tpu.memory_space<vmem>>, %arg4: memref<3x24x8xbf16, #tpu.memory_space<vmem>>, %arg5: memref<1x72x8xf32, #tpu.memory_space<vmem>>, %arg6: memref<1x2x8xf32, #tpu.memory_space<vmem>>, %arg7: memref<98x8xbf16, #tpu.memory_space<vmem>>) attributes {dimension_semantics = [#tpu.dimension_semantics<parallel>], iteration_bounds = array<i64: 2>, scalar_prefetch = 0 : i64, scratch_operands = 1 : i64, tpu.core_type = #tpu.core_type<tc>, window_params = [{transform_indices = @transform_0, window_bounds = array<i64: 1, 72, 8>}, {pipeline_mode = #tpu.pipeline_mode<synchronous>, transform_indices = @transform_1, window_bounds = array<i64: 1, 8>}, {pipeline_mode = #tpu.pipeline_mode<synchronous>, transform_indices = @transform_2, window_bounds = array<i64: 1, 8>}, {pipeline_mode = #tpu.pipeline_mode<synchronous>, transform_indices = @transform_3, window_bounds = array<i64: 3, 24, 8>}, {transform_indices = @transform_4, window_bounds = array<i64: 1, 72, 8>}, {transform_indices = @transform_5, window_bounds = array<i64: 1, 2, 8>}]} {
    %0 = tpu.iota {dimensions = array<i32: 0>} : vector<72x1xi32>
    %c9_i32 = arith.constant 9 : i32
    %c0_i32 = arith.constant 0 : i32
    %1 = arith.cmpi eq, %c9_i32, %c0_i32 : i32
    %c1_i32 = arith.constant 1 : i32
    %2 = arith.select %1, %c1_i32, %c9_i32 : i32
    %3 = vector.broadcast %2 : i32 to vector<72x1xi32>
    %4 = arith.remsi %0, %3 : vector<72x1xi32>
    %c0_i32_0 = arith.constant 0 : i32
    %5 = vector.broadcast %c0_i32_0 : i32 to vector<72x1xi32>
    %6 = arith.cmpi ne, %4, %5 : vector<72x1xi32>
    %c0_i32_1 = arith.constant 0 : i32
    %7 = vector.broadcast %c0_i32_1 : i32 to vector<72x1xi32>
    %8 = arith.cmpi slt, %4, %7 : vector<72x1xi32>
    %c0_i32_2 = arith.constant 0 : i32
    %9 = arith.cmpi slt, %2, %c0_i32_2 : i32
    %10 = vector.broadcast %9 : i1 to vector<72x1xi1>
    %11 = vector.broadcast %10 : vector<72x1xi1> to vector<72x1xi1>
    %12 = arith.xori %8, %11 : vector<72x1xi1>
    %13 = arith.andi %12, %6 : vector<72x1xi1>
    %14 = vector.broadcast %2 : i32 to vector<72x1xi32>
    %15 = arith.addi %4, %14 : vector<72x1xi32>
    %16 = arith.select %13, %15, %4 : vector<72x1xi1>, vector<72x1xi32>
    %c8_i32 = arith.constant 8 : i32
    %17 = vector.broadcast %c8_i32 : i32 to vector<72x1xi32>
    %18 = arith.cmpi slt, %16, %17 : vector<72x1xi32>
    %19 = arith.extui %18 : vector<72x1xi1> to vector<72x1xi32>
    %20 = arith.sitofp %19 : vector<72x1xi32> to vector<72x1xf32>
    %cst = arith.constant 0.000000e+00 : bf16
    %21 = vector.broadcast %cst : bf16 to vector<16x8xbf16>
    %c0 = arith.constant 0 : index
    %c0_3 = arith.constant 0 : index
    %22 = vector.load %arg7[%c0, %c0_3] : memref<98x8xbf16, #tpu.memory_space<vmem>>, vector<16x8xbf16>
    tpu.vector_store %arg7[%c0, %c0_3], %21 {strides = array<i32>} : memref<98x8xbf16, #tpu.memory_space<vmem>>, vector<16x8xbf16>,
    %cst_4 = arith.constant 0.000000e+00 : bf16
    %23 = vector.broadcast %cst_4 : bf16 to vector<10x8xbf16>
    %c88 = arith.constant 88 : index
    %c0_5 = arith.constant 0 : index
    %24 = vector.load %arg7[%c88, %c0_5] : memref<98x8xbf16, #tpu.memory_space<vmem>>, vector<10x8xbf16>
    tpu.vector_store %arg7[%c88, %c0_5], %23 {strides = array<i32>} : memref<98x8xbf16, #tpu.memory_space<vmem>>, vector<10x8xbf16>,
    %c0_6 = arith.constant 0 : index
    %c0_7 = arith.constant 0 : index
    %c0_8 = arith.constant 0 : index
    %25 = vector.load %arg1[%c0_6, %c0_7, %c0_8] : memref<1x72x8xf32, #tpu.memory_space<vmem>>, vector<1x72x8xf32>
    %26 = vector.shape_cast %25 : vector<1x72x8xf32> to vector<72x8xf32>
    %c0_9 = arith.constant 0 : index
    %c0_10 = arith.constant 0 : index
    %27 = vector.load %arg2[%c0_9, %c0_10] : memref<1x8xf32, #tpu.memory_space<vmem>>, vector<1x8xf32>
    %28 = vector.broadcast %27 : vector<1x8xf32> to vector<72x8xf32>
    %29 = arith.mulf %26, %28 : vector<72x8xf32>
    %c0_11 = arith.constant 0 : index
    %c0_12 = arith.constant 0 : index
    %30 = vector.load %arg3[%c0_11, %c0_12] : memref<1x8xf32, #tpu.memory_space<vmem>>, vector<1x8xf32>
    %31 = vector.broadcast %30 : vector<1x8xf32> to vector<72x8xf32>
    %32 = arith.addf %29, %31 : vector<72x8xf32>
    %cst_13 = arith.constant 0.000000e+00 : f32
    %33 = vector.broadcast %cst_13 : f32 to vector<72x8xf32>
    %34 = arith.maximumf %32, %33 : vector<72x8xf32>
    %35 = vector.broadcast %20 : vector<72x1xf32> to vector<72x8xf32>
    %36 = arith.mulf %34, %35 : vector<72x8xf32>
    %37 = arith.truncf %36 : vector<72x8xf32> to vector<72x8xbf16>
    %c16 = arith.constant 16 : index
    %c0_14 = arith.constant 0 : index
    %38 = vector.load %arg7[%c16, %c0_14] : memref<98x8xbf16, #tpu.memory_space<vmem>>, vector<72x8xbf16>
    tpu.vector_store %arg7[%c16, %c0_14], %37 {strides = array<i32>} : memref<98x8xbf16, #tpu.memory_space<vmem>>, vector<72x8xbf16>,
    %cst_15 = arith.constant 0.000000e+00 : f32
    %39 = vector.broadcast %cst_15 : f32 to vector<72x8xf32>
    %c6 = arith.constant 6 : index
    %c0_16 = arith.constant 0 : index
    %40 = vector.load %arg7[%c6, %c0_16] : memref<98x8xbf16, #tpu.memory_space<vmem>>, vector<72x8xbf16>
    %c7 = arith.constant 7 : index
    %c0_17 = arith.constant 0 : index
    %41 = vector.load %arg7[%c7, %c0_17] : memref<98x8xbf16, #tpu.memory_space<vmem>>, vector<72x8xbf16>
    %c8 = arith.constant 8 : index
    %c0_18 = arith.constant 0 : index
    %42 = vector.load %arg7[%c8, %c0_18] : memref<98x8xbf16, #tpu.memory_space<vmem>>, vector<72x8xbf16>
    %43 = tpu.concatenate %40, %41, %42 in 1 : vector<72x8xbf16>, vector<72x8xbf16>, vector<72x8xbf16> -> vector<72x24xbf16>
    %c0_19 = arith.constant 0 : index
    %c0_20 = arith.constant 0 : index
    %c0_21 = arith.constant 0 : index
    %44 = vector.load %arg4[%c0_19, %c0_20, %c0_21] : memref<3x24x8xbf16, #tpu.memory_space<vmem>>, vector<1x24x8xbf16>
    %45 = vector.shape_cast %44 : vector<1x24x8xbf16> to vector<24x8xbf16>
    %cst_22 = arith.constant dense<0.000000e+00> : vector<72x8xf32>
    %46 = tpu.matmul %43, %45, %cst_22 {dimension_numbers = #tpu.dot_dimension_numbers<[1], [0], [0], [1], [0, 0, 1, 1], [], []>} : vector<72x24xbf16>, vector<24x8xbf16>, vector<72x8xf32> -> vector<72x8xf32>
    %47 = arith.addf %39, %46 : vector<72x8xf32>
    %c15 = arith.constant 15 : index
    %c0_23 = arith.constant 0 : index
    %48 = vector.load %arg7[%c15, %c0_23] : memref<98x8xbf16, #tpu.memory_space<vmem>>, vector<72x8xbf16>
    %c16_24 = arith.constant 16 : index
    %c0_25 = arith.constant 0 : index
    %49 = vector.load %arg7[%c16_24, %c0_25] : memref<98x8xbf16, #tpu.memory_space<vmem>>, vector<72x8xbf16>
    %c17 = arith.constant 17 : index
    %c0_26 = arith.constant 0 : index
    %50 = vector.load %arg7[%c17, %c0_26] : memref<98x8xbf16, #tpu.memory_space<vmem>>, vector<72x8xbf16>
    %51 = tpu.concatenate %48, %49, %50 in 1 : vector<72x8xbf16>, vector<72x8xbf16>, vector<72x8xbf16> -> vector<72x24xbf16>
    %c1 = arith.constant 1 : index
    %c0_27 = arith.constant 0 : index
    %c0_28 = arith.constant 0 : index
    %52 = vector.load %arg4[%c1, %c0_27, %c0_28] : memref<3x24x8xbf16, #tpu.memory_space<vmem>>, vector<1x24x8xbf16>
    %53 = vector.shape_cast %52 : vector<1x24x8xbf16> to vector<24x8xbf16>
    %cst_29 = arith.constant dense<0.000000e+00> : vector<72x8xf32>
    %54 = tpu.matmul %51, %53, %cst_29 {dimension_numbers = #tpu.dot_dimension_numbers<[1], [0], [0], [1], [0, 0, 1, 1], [], []>} : vector<72x24xbf16>, vector<24x8xbf16>, vector<72x8xf32> -> vector<72x8xf32>
    %55 = arith.addf %47, %54 : vector<72x8xf32>
    %c24 = arith.constant 24 : index
    %c0_30 = arith.constant 0 : index
    %56 = vector.load %arg7[%c24, %c0_30] : memref<98x8xbf16, #tpu.memory_space<vmem>>, vector<72x8xbf16>
    %c25 = arith.constant 25 : index
    %c0_31 = arith.constant 0 : index
    %57 = vector.load %arg7[%c25, %c0_31] : memref<98x8xbf16, #tpu.memory_space<vmem>>, vector<72x8xbf16>
    %c26 = arith.constant 26 : index
    %c0_32 = arith.constant 0 : index
    %58 = vector.load %arg7[%c26, %c0_32] : memref<98x8xbf16, #tpu.memory_space<vmem>>, vector<72x8xbf16>
    %59 = tpu.concatenate %56, %57, %58 in 1 : vector<72x8xbf16>, vector<72x8xbf16>, vector<72x8xbf16> -> vector<72x24xbf16>
    %c2 = arith.constant 2 : index
    %c0_33 = arith.constant 0 : index
    %c0_34 = arith.constant 0 : index
    %60 = vector.load %arg4[%c2, %c0_33, %c0_34] : memref<3x24x8xbf16, #tpu.memory_space<vmem>>, vector<1x24x8xbf16>
    %61 = vector.shape_cast %60 : vector<1x24x8xbf16> to vector<24x8xbf16>
    %cst_35 = arith.constant dense<0.000000e+00> : vector<72x8xf32>
    %62 = tpu.matmul %59, %61, %cst_35 {dimension_numbers = #tpu.dot_dimension_numbers<[1], [0], [0], [1], [0, 0, 1, 1], [], []>} : vector<72x24xbf16>, vector<24x8xbf16>, vector<72x8xf32> -> vector<72x8xf32>
    %63 = arith.addf %55, %62 : vector<72x8xf32>
    %c0_36 = arith.constant 0 : index
    %c0_37 = arith.constant 0 : index
    %c0_38 = arith.constant 0 : index
    %64 = vector.load %arg5[%c0_36, %c0_37, %c0_38] : memref<1x72x8xf32, #tpu.memory_space<vmem>>, vector<1x72x8xf32>
    %65 = vector.shape_cast %64 : vector<1x72x8xf32> to vector<72x8xf32>
    %66 = vector.shape_cast %63 : vector<72x8xf32> to vector<1x72x8xf32>
    tpu.vector_store %arg5[%c0_36, %c0_37, %c0_38], %66 {strides = array<i32>} : memref<1x72x8xf32, #tpu.memory_space<vmem>>, vector<1x72x8xf32>,
    %67 = vector.broadcast %20 : vector<72x1xf32> to vector<72x8xf32>
    %68 = arith.mulf %63, %67 : vector<72x8xf32>
    %cst_39 = arith.constant dense<0.000000e+00> : vector<8xf32>
    %69 = vector.multi_reduction <add>, %68, %cst_39 [0] : vector<72x8xf32> to vector<8xf32>
    %70 = vector.shape_cast %69 : vector<8xf32> to vector<1x8xf32>
    %c0_40 = arith.constant 0 : index
    %c0_41 = arith.constant 0 : index
    %c0_42 = arith.constant 0 : index
    %71 = vector.load %arg6[%c0_40, %c0_41, %c0_42] : memref<1x2x8xf32, #tpu.memory_space<vmem>>, vector<1x1x8xf32>
    %72 = vector.shape_cast %71 : vector<1x1x8xf32> to vector<1x8xf32>
    %73 = vector.shape_cast %70 : vector<1x8xf32> to vector<1x1x8xf32>
    tpu.vector_store %arg6[%c0_40, %c0_41, %c0_42], %73 {strides = array<i32>} : memref<1x2x8xf32, #tpu.memory_space<vmem>>, vector<1x1x8xf32>,
    %74 = arith.mulf %68, %63 : vector<72x8xf32>
    %cst_43 = arith.constant dense<0.000000e+00> : vector<8xf32>
    %75 = vector.multi_reduction <add>, %74, %cst_43 [0] : vector<72x8xf32> to vector<8xf32>
    %76 = vector.shape_cast %75 : vector<8xf32> to vector<1x8xf32>
    %c0_44 = arith.constant 0 : index
    %c1_45 = arith.constant 1 : index
    %c0_46 = arith.constant 0 : index
    %77 = vector.load %arg6[%c0_44, %c1_45, %c0_46] : memref<1x2x8xf32, #tpu.memory_space<vmem>>, vector<1x1x8xf32>
    %78 = vector.shape_cast %77 : vector<1x1x8xf32> to vector<1x8xf32>
    %79 = vector.shape_cast %76 : vector<1x8xf32> to vector<1x1x8xf32>
    tpu.vector_store %arg6[%c0_44, %c1_45, %c0_46], %79 {strides = array<i32>} : memref<1x2x8xf32, #tpu.memory_space<vmem>>, vector<1x1x8xf32>,
    return
  }
  func.func @transform_0(%arg0: i32) -> (i32, i32, i32) {
    %c0_i32 = arith.constant 0 : i32
    %c0_i32_0 = arith.constant 0 : i32
    %c0_i32_1 = arith.constant 0 : i32
    return %arg0, %c0_i32, %c0_i32_0 : i32, i32, i32
  }
  func.func @transform_1(%arg0: i32) -> (i32, i32) {
    %c0_i32 = arith.constant 0 : i32
    %c0_i32_0 = arith.constant 0 : i32
    %c0_i32_1 = arith.constant 0 : i32
    return %c0_i32, %c0_i32_0 : i32, i32
  }
  func.func @transform_2(%arg0: i32) -> (i32, i32) {
    %c0_i32 = arith.constant 0 : i32
    %c0_i32_0 = arith.constant 0 : i32
    %c0_i32_1 = arith.constant 0 : i32
    return %c0_i32, %c0_i32_0 : i32, i32
  }
  func.func @transform_3(%arg0: i32) -> (i32, i32, i32) {
    %c0_i32 = arith.constant 0 : i32
    %c0_i32_0 = arith.constant 0 : i32
    %c0_i32_1 = arith.constant 0 : i32
    %c0_i32_2 = arith.constant 0 : i32
    return %c0_i32, %c0_i32_0, %c0_i32_1 : i32, i32, i32
  }
  func.func @transform_4(%arg0: i32) -> (i32, i32, i32) {
    %c0_i32 = arith.constant 0 : i32
    %c0_i32_0 = arith.constant 0 : i32
    %c0_i32_1 = arith.constant 0 : i32
    return %arg0, %c0_i32, %c0_i32_0 : i32, i32, i32
  }
  func.func @transform_5(%arg0: i32) -> (i32, i32, i32) {
    %c0_i32 = arith.constant 0 : i32
    %c0_i32_0 = arith.constant 0 : i32
    %c0_i32_1 = arith.constant 0 : i32
    return %arg0, %c0_i32, %c0_i32_0 : i32, i32, i32
  }
}

module attributes {stable_mosaic.version = 11 : i64} {
  func.func @_fused_bn_add_relu_kernel(%arg0: i32, %arg1: memref<9x128xf32, #tpu.memory_space<vmem>>, %arg2: memref<9x128xf32, #tpu.memory_space<vmem>>, %arg3: memref<1x128xf32, #tpu.memory_space<vmem>>, %arg4: memref<1x128xf32, #tpu.memory_space<vmem>>, %arg5: memref<1x128xf32, #tpu.memory_space<vmem>>, %arg6: memref<9x128xf32, #tpu.memory_space<vmem>>) attributes {dimension_semantics = [#tpu.dimension_semantics<parallel>], iteration_bounds = array<i64: 1>, scalar_prefetch = 0 : i64, scratch_operands = 0 : i64, tpu.core_type = #tpu.core_type<tc>, window_params = [{transform_indices = @transform_0, window_bounds = array<i64: 9, 128>}, {transform_indices = @transform_1, window_bounds = array<i64: 9, 128>}, {pipeline_mode = #tpu.pipeline_mode<synchronous>, transform_indices = @transform_2, window_bounds = array<i64: 1, 128>}, {pipeline_mode = #tpu.pipeline_mode<synchronous>, transform_indices = @transform_3, window_bounds = array<i64: 1, 128>}, {pipeline_mode = #tpu.pipeline_mode<synchronous>, transform_indices = @transform_4, window_bounds = array<i64: 1, 128>}, {transform_indices = @transform_5, window_bounds = array<i64: 9, 128>}]} {
    %c0 = arith.constant 0 : index
    %c0_0 = arith.constant 0 : index
    %0 = vector.load %arg1[%c0, %c0_0] : memref<9x128xf32, #tpu.memory_space<vmem>>, vector<9x128xf32>
    %c0_1 = arith.constant 0 : index
    %c0_2 = arith.constant 0 : index
    %1 = vector.load %arg3[%c0_1, %c0_2] : memref<1x128xf32, #tpu.memory_space<vmem>>, vector<1x128xf32>
    %2 = vector.broadcast %1 : vector<1x128xf32> to vector<9x128xf32>
    %3 = arith.mulf %0, %2 : vector<9x128xf32>
    %c0_3 = arith.constant 0 : index
    %c0_4 = arith.constant 0 : index
    %4 = vector.load %arg2[%c0_3, %c0_4] : memref<9x128xf32, #tpu.memory_space<vmem>>, vector<9x128xf32>
    %c0_5 = arith.constant 0 : index
    %c0_6 = arith.constant 0 : index
    %5 = vector.load %arg4[%c0_5, %c0_6] : memref<1x128xf32, #tpu.memory_space<vmem>>, vector<1x128xf32>
    %6 = vector.broadcast %5 : vector<1x128xf32> to vector<9x128xf32>
    %7 = arith.mulf %4, %6 : vector<9x128xf32>
    %8 = arith.addf %3, %7 : vector<9x128xf32>
    %c0_7 = arith.constant 0 : index
    %c0_8 = arith.constant 0 : index
    %9 = vector.load %arg5[%c0_7, %c0_8] : memref<1x128xf32, #tpu.memory_space<vmem>>, vector<1x128xf32>
    %10 = vector.broadcast %9 : vector<1x128xf32> to vector<9x128xf32>
    %11 = arith.addf %8, %10 : vector<9x128xf32>
    %cst = arith.constant 0.000000e+00 : f32
    %12 = vector.broadcast %cst : f32 to vector<9x128xf32>
    %13 = arith.maximumf %11, %12 : vector<9x128xf32>
    %c0_9 = arith.constant 0 : index
    %c0_10 = arith.constant 0 : index
    %14 = vector.load %arg6[%c0_9, %c0_10] : memref<9x128xf32, #tpu.memory_space<vmem>>, vector<9x128xf32>
    tpu.vector_store %arg6[%c0_9, %c0_10], %13 {strides = array<i32>} : memref<9x128xf32, #tpu.memory_space<vmem>>, vector<9x128xf32>,
    return
  }
  func.func @transform_0(%arg0: i32) -> (i32, i32) {
    %c0_i32 = arith.constant 0 : i32
    %c0_i32_0 = arith.constant 0 : i32
    return %arg0, %c0_i32 : i32, i32
  }
  func.func @transform_1(%arg0: i32) -> (i32, i32) {
    %c0_i32 = arith.constant 0 : i32
    %c0_i32_0 = arith.constant 0 : i32
    return %arg0, %c0_i32 : i32, i32
  }
  func.func @transform_2(%arg0: i32) -> (i32, i32) {
    %c0_i32 = arith.constant 0 : i32
    %c0_i32_0 = arith.constant 0 : i32
    %c0_i32_1 = arith.constant 0 : i32
    return %c0_i32, %c0_i32_0 : i32, i32
  }
  func.func @transform_3(%arg0: i32) -> (i32, i32) {
    %c0_i32 = arith.constant 0 : i32
    %c0_i32_0 = arith.constant 0 : i32
    %c0_i32_1 = arith.constant 0 : i32
    return %c0_i32, %c0_i32_0 : i32, i32
  }
  func.func @transform_4(%arg0: i32) -> (i32, i32) {
    %c0_i32 = arith.constant 0 : i32
    %c0_i32_0 = arith.constant 0 : i32
    %c0_i32_1 = arith.constant 0 : i32
    return %c0_i32, %c0_i32_0 : i32, i32
  }
  func.func @transform_5(%arg0: i32) -> (i32, i32) {
    %c0_i32 = arith.constant 0 : i32
    %c0_i32_0 = arith.constant 0 : i32
    return %arg0, %c0_i32 : i32, i32
  }
}

</mosaic_0001>

<bundles_post_ra>
// kernel: basic_block_forward.5
= control target key start
LH: loop header
LB: loop body
LE: loop exit
PB: predicated region body
PF: predicated region fallthrough
CT: control target
= control target key end

     0   :  { %s121_s0 = inlined_call_operand.vmem [shape: f32[9,128], index: 0, kind: input, shape index: {}]   ;;  %s122_s1 = inlined_call_operand.vmem [shape: f32[9,128], index: 1, kind: input, shape index: {}]   ;;  %s123_s2 = inlined_call_operand.vmem [shape: f32[1,128], index: 2, kind: input, shape index: {}]   ;;  %s124_s3 = inlined_call_operand.vmem [shape: f32[1,128], index: 3, kind: input, shape index: {}]   ;;  %s125_s4 = inlined_call_operand.vmem [shape: f32[1,128], index: 4, kind: input, shape index: {}]   ;;  %s126_s5 = inlined_call_operand.vmem [shape: f32[9,128], index: 5, kind: output, shape index: {}]  }
   0x1   :  { %v20_v0 = vld [vmem:[%s121_s0] sm:$0xff]  ;;  %v21_v5 = vld [vmem:[%s121_s0 + $0x8] sm:$0x1] }
   0x2   :  { %v61_v1 = vld [vmem:[%s123_s2] ss:$0 sm:$0xff]  ;;  %v32_v8 = vld [vmem:[%s122_s1 + $0x8] sm:$0x1] }
   0x3   :  { %v31_v2 = vld [vmem:[%s122_s1] sm:$0xff]  ;;  %v29_v3 = vmul.f32 %v61_v1, %v20_v0  ;;  %v30_v7 = vmul.f32 %v61_v1, %v21_v5 }
   0x4   :  { %v62_v4 = vld [vmem:[%s124_s3] ss:$0 sm:$0xff] }
   0x5   :  { %v40_v6 = vmul.f32 %v62_v4, %v31_v2  ;;  %v63_v9 = vld [vmem:[%s125_s4] ss:$0 sm:$0xff]  ;;  %v41_v10 = vmul.f32 %v62_v4, %v32_v8 }
   0x7   :  { %v42_v11 = vadd.f32 %v40_v6, %v29_v3  ;;  %v43_v12 = vadd.f32 %v41_v10, %v30_v7 }
   0x9   :  { %v51_v13 = vadd.f32 %v63_v9, %v42_v11  ;;  %v52_v14 = vadd.f32 %v63_v9, %v43_v12 }
   0xb   :  { %v53_v15 = vmax.f32 %v51_v13, 0.0  ;;  %v54_v16 = vmax.f32 %v52_v14, 0.0 }
   0xd   :  { %55 = vst [vmem:[%s126_s5] sm:$0xff] %v53_v15  ;;  %56 = vst [vmem:[%s126_s5 + $0x8] sm:$0x1] %v54_v16 }

// kernel: basic_block_forward.4
= control target key start
LH: loop header
LB: loop body
LE: loop exit
PB: predicated region body
PF: predicated region fallthrough
CT: control target
= control target key end

     0   :  { %s1728_s18 = smov 0   ;;  %s2303_s0 = inlined_call_operand.vmem [shape: f32[2,72,8], index: 0, kind: input, shape index: {}]   ;;  %s2304_s1 = inlined_call_operand.vmem [shape: f32[1,8], index: 1, kind: input, shape index: {}]   ;;  %s2305_s2 = inlined_call_operand.vmem [shape: f32[1,8], index: 2, kind: input, shape index: {}]   ;;  %s2306_s3 = inlined_call_operand.vmem [shape: bf16[3,24,8], index: 3, kind: input, shape index: {}]   ;;  %s2307_s4 = inlined_call_operand.vmem [shape: f32[2,72,8], index: 4, kind: output, shape index: {0}]   ;;  %s2308_s5 = inlined_call_operand.vmem [shape: f32[2,2,8], index: 5, kind: output, shape index: {1}]  }
   0x1 LB: > { %s1418_s19 = sadd.s32 4294967295, %s1691_s18   ;;  %p1422_p0 = scmp.ge.s32.totalorder %s1691_s18, 1  ;;  %s1691_s18 = sphi %s1728_s18, %s16_s18  }
   0x2   : > { %p190_p1 = scmp.lt.s32.totalorder %s1691_s18, 3 }
   0x4   : > { %p191_p2 = pnand %p1422_p0, %p190_p1 }
   0x5   : > { %p222_p3 = scmp.lt.s32.totalorder (!%p191_p2), %s1418_s19, 1  ;;  %v237_v0 = vlaneseq (!%p191_p2)  ;;  %vm418_vm0 = vcmask (!%p191_p2), 60416   ;;  %v1693_v1 = vmov (!%p191_p2), 0   ;;  %vm422_vm1 = vcmask (!%p191_p2), 57344   ;;  %v1753_v7 = vld [vmem:[%s2304_s1] ss:$0 sm:$0xff] (!%p191_p2) }
   0x6   : > { %194 = sbr.rel (%p191_p2) target bundleno = 469 (0x1d5), region = 36  ;;  %419 = vst.msk [vmem:[#allocation2] sm:$0xf] (!%p191_p2), %vm418_vm0, %v1693_v1  ;;  %420 = vst.msk [vmem:[#allocation2 + $0x4] sm:$0xf] (!%p191_p2), %vm418_vm0, %v1693_v1  ;;  %v1694_v2 = vmov (!%p191_p2), 0.0  }
   0x7   : > { %421 = vst.msk [vmem:[#allocation2 + $0x2c] sm:$0xf] (!%p191_p2), %vm418_vm0, %v1693_v1  ;;  %1551 = vmatprep.subr.bf16.mxu0 (!%p191_p2), %v1694_v2  ;;  %1527 = vmatprep.subr.bf16.mxu1 (!%p191_p2), %v1694_v2  ;;  %v1743_v3 = vshrl.u32 (!%p191_p2), %v237_v0, 7  ;;  %v1762_v10 = vld [vmem:[%s2305_s2] ss:$0 sm:$0xff] (!%p191_p2)  ;;  %s1695_s30 = smov (!%p191_p2), 16  }
   0x8   : > { %423 = vst.msk [vmem:[#allocation2 + $0x30] sm:$0x1] (!%p191_p2), %vm422_vm1, %v1693_v1  ;;  %s1696_s6 = smov (!%p191_p2), 8  }
   0x9   : > { %v239_v4 = vadd.s32 (!%p191_p2), 8, %v1743_v3  ;;  %v240_v5 = vadd.s32 (!%p191_p2), 16, %v1743_v3  ;;  %v241_v6 = vadd.s32 (!%p191_p2), 24, %v1743_v3  ;;  %v1765_v11 = vadd.s32 (!%p191_p2), 32, %v1743_v3 }
   0xa   : > { %v1756_v8 = vmul.u32.u64.low (!%p191_p2), 3817748708, %v1743_v3  ;;  %v1757_v9 = vmul.u32.u64.high 3817748708, %v1743_v3, %v1756_v8  ;;  %v1787_v21 = vadd.s32 (!%p191_p2), 40, %v1743_v3  ;;  %v1794_v26 = vadd.s32 (!%p191_p2), 48, %v1743_v3 }
   0xb   : > { %v1774_v12 = vmul.u32.u64.low (!%p191_p2), 3817748708, %v239_v4  ;;  %v1775_v13 = vmul.u32.u64.high 3817748708, %v239_v4, %v1774_v12  ;;  %v1777_v14 = vmul.u32.u64.low (!%p191_p2), 3817748708, %v240_v5  ;;  %v1778_v15 = vmul.u32.u64.high 3817748708, %v240_v5, %v1777_v14 }
   0xc   : > { %v1780_v16 = vmul.u32.u64.low (!%p191_p2), 3817748708, %v241_v6  ;;  %v1781_v17 = vmul.u32.u64.high 3817748708, %v241_v6, %v1780_v16  ;;  %v253_v27 = vshrl.u32 (!%p191_p2), %v1757_v9, 3  ;;  %v1801_v31 = vadd.s32 (!%p191_p2), 56, %v1743_v3 }
   0xd   : > { %s2316_s19 = smov (!%p222_p3, %s1418_s19), 1  ;;  %v529_v29 = vld [vmem:[#allocation2] sm:$0x8]  ;;  %v1798_v30 = vld [vmem:[#allocation2 + $0x4] sm:$0xf]  ;;  %v264_v32 = vshrl.u32 %v1775_v13, 3 }
   0xe   : > { %s1632_s20 = smul.u32 72, %s2316_s19  ;;  %v275_v33 = vshrl.u32 %v1778_v15, 3  ;;  %v254_v36 = vmul.u32 9, %v253_v27  ;;  %v286_v37 = vshrl.u32 %v1781_v17, 3  ;;  %v1811_v43 = vcombine.low %v529_v29, %v1798_v30 }
   0xf   : > { %v265_v40 = vmul.u32 9, %v264_v32 }
  0x10   : > { %s1772_s27 = scalar_lea.vmem %s2303_s0, %s1632_s20  ;;  %v276_v41 = vmul.u32 9, %v275_v33  ;;  %v255_v44 = vsub.s32 %v1743_v3, %v254_v36  ;;  %v287_v45 = vmul.u32 9, %v286_v37  ;;  %v570_v51 = vshrl.u32 %v1811_v43, 16  ;;  %s2247_s22 = scalar_lea.vmem %s2307_s4, %s1632_s20 }
  0x11   : > { %v424_v18 = vld [vmem:[%s1772_s27] sm:$0xff]  ;;  %v425_v19 = vld [vmem:[%s1772_s27 + $0x8] sm:$0xff]  ;;  %v426_v20 = vld [vmem:[%s1772_s27 + $0x10] sm:$0xff]  ;;  %v266_v48 = vsub.s32 %v239_v4, %v265_v40  ;;  %v572_v60 = vshll.u32 %v1811_v43, 16  ;;  %v1856_v32 = vmul.u32.u64.low 3817748708, %v1794_v26  ;;  %v1857_v33 = vmul.u32.u64.high 3817748708, %v1794_v26, %v1856_v32 }
  0x12   : > { %v427_v22 = vld [vmem:[%s1772_s27 + $0x18] sm:$0xff]  ;;  %v440_v23 = vmul.f32 %v1753_v7, %v424_v18  ;;  %v441_v24 = vmul.f32 %v1753_v7, %v425_v19  ;;  %v442_v25 = vmul.f32 %v1753_v7, %v426_v20  ;;  %v277_v49 = vsub.s32 %v240_v5, %v276_v41  ;;  %v428_v54 = vld [vmem:[%s1772_s27 + $0x20] sm:$0xff]  ;;  %v429_v55 = vld [vmem:[%s1772_s27 + $0x28] sm:$0xff]  ;;  %s1425_s20 = sshll.u32 %s2316_s19, 1 }
  0x13   : > { %v443_v28 = vmul.f32 %v1753_v7, %v427_v22  ;;  %v288_v52 = vsub.s32 %v241_v6, %v287_v45  ;;  %vm346_vm2 = vcmp.ne.s32.totalorder %v255_v44, 0  ;;  %vm355_vm3 = vcmp.lt.s32.totalorder %v255_v44, 0  ;;  %v430_v15 = vld [vmem:[%s1772_s27 + $0x30] sm:$0xff]  ;;  %v431_v40 = vld [vmem:[%s1772_s27 + $0x38] sm:$0xff]  ;;  %s235_s25 = scalar_lea.vmem %s2308_s5, %s1425_s20 }
  0x14   : > { %v456_v34 = vadd.f32 %v1762_v10, %v440_v23  ;;  %v457_v35 = vadd.f32 %v1762_v10, %v441_v24  ;;  %v458_v38 = vadd.f32 %v1762_v10, %v442_v25  ;;  %v373_v53 = vadd.s32 9, %v255_v44  ;;  %vm364_vm8 = vmand %vm355_vm3, %vm346_vm2 }
  0x15   : > { %v459_v39 = vadd.f32 %v1762_v10, %v443_v28  ;;  %vm347_vm4 = vcmp.ne.s32.totalorder %v266_v48, 0  ;;  %vm348_vm5 = vcmp.ne.s32.totalorder %v277_v49, 0  ;;  %vm356_vm6 = vcmp.lt.s32.totalorder %v266_v48, 0 }
  0x16   : > { %v465_v42 = vmax.f32 %v456_v34, 0.0  ;;  %v466_v46 = vmax.f32 %v457_v35, 0.0  ;;  %v467_v47 = vmax.f32 %v458_v38, 0.0  ;;  %vm357_vm7 = vcmp.lt.s32.totalorder %v277_v49, 0  ;;  %vm365_vm11 = vmand %vm356_vm6, %vm347_vm4 }
  0x17   : > { %v468_v50 = vmax.f32 %v459_v39, 0.0  ;;  %vm349_vm9 = vcmp.ne.s32.totalorder %v288_v52, 0  ;;  %vm358_vm10 = vcmp.lt.s32.totalorder %v288_v52, 0  ;;  %v374_v56 = vadd.s32 9, %v266_v48  ;;  %vm366_vm12 = vmand %vm357_vm7, %vm348_vm5 }
  0x18   : > { %v375_v57 = vadd.s32 9, %v277_v49  ;;  %v376_v58 = vadd.s32 9, %v288_v52  ;;  %v382_v59 = vsel %vm364_vm8, %v373_v53, %v255_v44  ;;  %v444_v61 = vmul.f32 %v1753_v7, %v428_v54  ;;  %vm367_vm13 = vmand %vm358_vm10, %vm349_vm9 }
  0x19   : > { %v383_v62 = vsel %vm365_vm11, %v374_v56, %v266_v48  ;;  %vm391_vm14 = vcmp.lt.s32.totalorder %v382_v59, 8  ;;  %v445_v0 = vmul.f32 %v1753_v7, %v429_v55  ;;  %v574_v14 = vrot.slane %v572_v60, 1 }
  0x1a   : > { %v384_v63 = vsel %vm366_vm12, %v375_v57, %v277_v49  ;;  %v385_v1 = vsel %vm367_vm13, %v376_v58, %v288_v52  ;;  %vm392_vm15 = vcmp.lt.s32.totalorder %v383_v62, 8  ;;  %v1821_v4 = vsel %vm391_vm14, 1.0, %v1694_v2 }
  0x1b   : > { %vm393_vm2 = vcmp.lt.s32.totalorder %v384_v63, 8  ;;  %vm394_vm3 = vcmp.lt.s32.totalorder %v385_v1, 8  ;;  %v1824_v5 = vsel %vm392_vm15, 1.0, %v1694_v2  ;;  %v474_v8 = vmul.f32 %v1821_v4, %v465_v42 }
  0x1c   : > { %v1827_v6 = vsel %vm393_vm2, 1.0, %v1694_v2  ;;  %v1831_v9 = vsel %vm394_vm3, 1.0, %v1694_v2  ;;  %v475_v12 = vmul.f32 %v1824_v5, %v466_v46  ;;  %v1847_v27 = vadd.f32 %v1762_v10, %v444_v61 }
  0x1d   : > { %v476_v13 = vmul.f32 %v1827_v6, %v467_v47  ;;  %v477_v16 = vmul.f32 %v1831_v9, %v468_v50  ;;  %v1497_v17 = vpack.c.bf16 %v474_v8, %v474_v8  ;;  %v1850_v28 = vadd.f32 %v1762_v10, %v445_v0  ;;  %v432_v47 = vld [vmem:[%s1772_s27 + $0x40] sm:$0xff] }
  0x1e   : > { %v1838_v18 = vmul.u32.u64.low 3817748708, %v1765_v11  ;;  %v1839_v19 = vmul.u32.u64.high 3817748708, %v1765_v11, %v1838_v18  ;;  %v1498_v20 = vpack.c.bf16 %v475_v12, %v475_v12  ;;  %v446_v29 = vmul.f32 %v1753_v7, %v430_v15 }
  0x1f   : > { %v1499_v22 = vpack.c.bf16 %v476_v13, %v476_v13  ;;  %v1842_v23 = vmul.u32.u64.low 3817748708, %v1787_v21  ;;  %v1843_v24 = vmul.u32.u64.high 3817748708, %v1787_v21, %v1842_v23  ;;  %v1500_v25 = vpack.c.bf16 %v477_v16, %v477_v16  ;;  %520 = vst.msk [vmem:[#allocation2 + $0x8] sm:$0xf] %vm418_vm0, %v1497_v17 }
  0x20   : > { %521 = vst.msk [vmem:[#allocation2 + $0xc] sm:$0xf] %vm418_vm0, %v1498_v20  ;;  %v1860_v34 = vmul.u32.u64.low 3817748708, %v1801_v31  ;;  %v1861_v35 = vmul.u32.u64.high 3817748708, %v1801_v31, %v1860_v34  ;;  %v297_v36 = vshrl.u32 %v1839_v19, 3  ;;  %v1866_v37 = vadd.s32 64, %v1743_v3 }
  0x21   : > { %522 = vst.msk [vmem:[#allocation2 + $0x10] sm:$0xf] %vm418_vm0, %v1499_v22  ;;  %523 = vst.msk [vmem:[#allocation2 + $0x14] sm:$0xf] %vm418_vm0, %v1500_v25  ;;  %v308_v38 = vshrl.u32 %v1843_v24, 3  ;;  %v1870_v39 = vadd.f32 %v1762_v10, %v446_v29  ;;  %vm623_vm4 = vcmask 1042432   ;;  %v575_v41 = vor.u32 %v574_v14, %v570_v51 }
  0x22   : > { %vm568_vm5 = vsmask.f32 7424  ;;  %v298_v42 = vmul.u32 9, %v297_v36  ;;  %v469_v45 = vmax.f32 %v1847_v27, 0.0  ;;  %v470_v46 = vmax.f32 %v1850_v28, 0.0 }
  0x23   : > { %v309_v44 = vmul.u32 9, %v308_v38  ;;  %v319_v3 = vshrl.u32 %v1857_v33, 3  ;;  %v447_v49 = vmul.f32 %v1753_v7, %v431_v40  ;;  %vm679_vm6 = vsmask.f32 3328 }
  0x24   : > { %v299_v48 = vsub.s32 %v1765_v11, %v298_v42  ;;  %v1882_v50 = vmul.u32.u64.low 3817748708, %v1866_v37  ;;  %v1883_v52 = vmul.u32.u64.high 3817748708, %v1866_v37, %v1882_v50  ;;  %v471_v55 = vmax.f32 %v1870_v39, 0.0  ;;  %v1893_v11 = vld [vmem:[%s2306_s3] sm:$0xff]   ;;  %v1679_v39 = vld [vmem:[%s2306_s3 + $0x8] ss:$0 sps:$4 sm:$0xff]  }
  0x25   : > { %v310_v51 = vsub.s32 %v1787_v21, %v309_v44  ;;  %v320_v54 = vmul.u32 9, %v319_v3  ;;  %v330_v56 = vshrl.u32 %v1861_v35, 3  ;;  %v1898_v60 = vmul.f32 %v1753_v7, %v432_v47  ;;  %1552 = vmatpush3.bf16.msra.mxu0 %v1893_v11 }
  0x26   : > { %v1885_v53 = vld [vmem:[#allocation2 + $0x8] sm:$0xf]  ;;  %vm350_vm7 = vcmp.ne.s32.totalorder %v299_v48, 0  ;;  %vm359_vm8 = vcmp.lt.s32.totalorder %v299_v48, 0  ;;  %v377_v0 = vadd.s32 9, %v299_v48  ;;  %1553 = vmatprep.subr.bf16.mxu0 %v1694_v2  ;;  %v463_v33 = vadd.f32 %v1762_v10, %v447_v49 }
  0x27   : > { %v532_v57 = vld [vmem:[#allocation2 + $0xc] sm:$0xf]  ;;  %v1452_v59 = vcombine.low %v1798_v30, %v1885_v53  ;;  %vm351_vm9 = vcmp.ne.s32.totalorder %v310_v51, 0  ;;  %vm360_vm10 = vcmp.lt.s32.totalorder %v310_v51, 0  ;;  %vm1907_vm11 = vmand %vm359_vm8, %vm350_vm7  ;;  %v378_v1 = vadd.s32 9, %v310_v51 }
  0x28   : > { %v533_v58 = vld [vmem:[#allocation2 + $0x10] sm:$0xf]  ;;  %v1900_v21 = vld [vmem:[#allocation2 + $0x14] sm:$0xf]  ;;  %v1905_v62 = vcombine.low %v1885_v53, %v532_v57  ;;  %vm1926_vm12 = vmand %vm360_vm10, %vm351_vm9  ;;  %v386_v19 = vsel %vm1907_vm11, %v377_v0, %v299_v48  ;;  %v331_v32 = vmul.u32 9, %v330_v56  ;;  %v321_v47 = vsub.s32 %v1794_v26, %v320_v54 }
  0x29   : > { %v1902_v61 = vcombine.low %v532_v57, %v533_v58  ;;  %v1913_v30 = vcombine.low %v533_v58, %v1900_v21  ;;  %v624_v7 = vrot.slane %v1452_v59, 5  ;;  %v387_v38 = vsel %vm1926_vm12, %v378_v1, %v310_v51  ;;  %v1021_v18 = vld [vmem:[#allocation2 + $0xc] sm:$0xf] }
  0x2a   : > { %v577_v12 = vshll.u32 %v1905_v62, 16  ;;  %v581_v13 = vshrl.u32 %v1905_v62, 16  ;;  %v717_v14 = vrot.slane %v1905_v62, 5  ;;  %vm395_vm13 = vcmp.lt.s32.totalorder %v386_v19, 8  ;;  %v2007_v19 = vld [vmem:[#allocation2 + $0x10] sm:$0xf] }
  0x2b   : > { %v625_v8 = vrot.slane %v1902_v61, 5  ;;  %633 = vrot.lane.b32.xlu1 %v624_v7, %s1695_s30  ;;  %v585_v15 = vshll.u32 %v1913_v30, 16  ;;  %v589_v16 = vshrl.u32 %v1913_v30, 16  ;;  %v718_v17 = vrot.slane %v1913_v30, 5 }
  0x2c   : > { %v579_v22 = vrot.slane %v577_v12, 1  ;;  %v680_v23 = vrot.slane %v581_v13, 4  ;;  %v681_v24 = vrot.slane %v577_v12, 5  ;;  %vm396_vm14 = vcmp.lt.s32.totalorder %v387_v38, 8 }
  0x2d   : > { %v626_v20 = vsel %vm623_vm4, %v624_v7, %v625_v8  ;;  %v683_v25 = vrot.slane %v589_v16, 4  ;;  %v684_v29 = vrot.slane %v585_v15, 5  ;;  %v719_v36 = vsel %vm623_vm4, %v717_v14, %v718_v17 }
  0x2e   : > { %v580_v34 = vsel %vm568_vm5, %v575_v41, %v579_v22  ;;  %v682_v35 = vor.u32 %v681_v24, %v680_v23  ;;  %v1950_v42 = vrot.slane %v585_v15, 1  ;;  %v583_v41 = vor.u32 %v581_v13, %v579_v22 }
  0x2f   : > { %635 = vrot.lane.b32.xlu1 %v626_v20, %s1695_s30  ;;  %608 = vrot.lane.b32.xlu0 %v580_v34, %s1696_s6  ;;  %v1948_v40 = vor.u32 %v684_v29, %v683_v25  ;;  %v1953_v44 = vsel %vm395_vm13, 1.0, %v1694_v2  ;;  %v1956_v3 = vsel %vm396_vm14, 1.0, %v1694_v2  ;;  %v332_v51 = vsub.s32 %v1801_v31, %v331_v32 }
  0x30   : > { %v478_v49 = vmul.f32 %v1953_v44, %v469_v45  ;;  %v479_v50 = vmul.f32 %v1956_v3, %v470_v46  ;;  %vm352_vm15 = vcmp.ne.s32.totalorder %v321_v47, 0  ;;  %vm361_vm2 = vcmp.lt.s32.totalorder %v321_v47, 0 }
  0x31   : > { %v686_v48 = vsel %vm679_vm6, %v682_v35, %v1948_v40  ;;  %v379_v56 = vadd.s32 9, %v321_v47  ;;  %v341_v57 = vshrl.u32 %v1883_v52, 3  ;;  %vm370_vm3 = vmand %vm361_vm2, %vm352_vm15  ;;  %vm353_vm7 = vcmp.ne.s32.totalorder %v332_v51, 0  ;;  %v1680_v52 = vld [vmem:[%s2306_s3 + $0xc] sm:$0xff]  }
  0x32   : > { %v1501_v26 = vpack.c.bf16 %v478_v49, %v478_v49  ;;  %v1502_v54 = vpack.c.bf16 %v479_v50, %v479_v50  ;;  %vm362_vm8 = vcmp.lt.s32.totalorder %v332_v51, 0  ;;  %v588_v27 = vsel %vm568_vm5, %v583_v41, %v1950_v42  ;;  %1528 = vmatpush3.bf16.msra.mxu1 %v1680_v52 }
  0x33   : > { %706 = vrot.lane.b32.xlu1 %v686_v48, %s1696_s6  ;;  %704 = vrot.lane.b32.xlu0 %v682_v35, %s1696_s6  ;;  %v388_v28 = vsel %vm370_vm3, %v379_v56, %v321_v47  ;;  %vm1973_vm9 = vmand %vm362_vm8, %vm353_vm7  ;;  %v380_v45 = vadd.s32 9, %v332_v51  ;;  %v342_v46 = vmul.u32 9, %v341_v57  ;;  %v472_v58 = vmax.f32 %v463_v33, 0.0 }
  0x34   : > { %524 = vst.msk [vmem:[#allocation2 + $0x18] sm:$0xf] %vm418_vm0, %v1501_v26  ;;  %525 = vst.msk [vmem:[#allocation2 + $0x1c] sm:$0xf] %vm418_vm0, %v1502_v54  ;;  %vm397_vm10 = vcmp.lt.s32.totalorder %v388_v28, 8  ;;  %v464_v59 = vadd.f32 %v1762_v10, %v1898_v60  ;;  %1529 = vmatprep.subr.bf16.mxu1 %v1694_v2  ;;  %vm830_vm2 = vcmask 1043456   ;;  %v591_v29 = vor.u32 %v589_v16, %v1950_v42 }
  0x35   : > { %v1985_v63 = vsel %vm397_vm10, 1.0, %v1694_v2  ;;  %v389_v7 = vsel %vm1973_vm9, %v380_v45, %v332_v51  ;;  %v343_v0 = vsub.s32 %v1866_v37, %v342_v46  ;;  %v1479_v32 = vcombine.low %v1021_v18, %v2007_v19  ;;  %v1682_v26 = vld [vmem:[%s2306_s3 + $0x14] ss:$0 sps:$4 sm:$0xff]  }
  0x36   : > { %v480_v1 = vmul.f32 %v1985_v63, %v471_v55  ;;  %vm398_vm11 = vcmp.lt.s32.totalorder %v389_v7, 8  ;;  %v473_v13 = vmax.f32 %v464_v59, 0.0  ;;  %v2024_v33 = vsel %vm830_vm2, %v1679_v39, 0  ;;  %v671_v59 = vld [vmem:[#allocation2 + $0x2c] sm:$0x1] }
  0x37   : > { %728 = vrot.lane.b32.xlu1 %v719_v36, %s1695_s30  ;;  %610 = vrot.lane.b32.xlu0 %v588_v27, %s1696_s6  ;;  %v1996_v10 = vsel %vm398_vm11, 1.0, %v1694_v2  ;;  %vm354_vm12 = vcmp.ne.s32.totalorder %v343_v0, 0  ;;  %vm363_vm13 = vcmp.lt.s32.totalorder %v343_v0, 0  ;;  %v381_v60 = vadd.s32 9, %v343_v0 }
  0x38   : > { %v1503_v12 = vpack.c.bf16 %v480_v1, %v480_v1  ;;  %v481_v37 = vmul.f32 %v1996_v10, %v472_v58  ;;  %vm372_vm14 = vmand %vm363_vm13, %vm354_vm12  ;;  %1554 = vmatpush3.bf16.msra.mxu0 %v2024_v33  ;;  %vm1697_vm3 = vmmov 0   ;;  %v1060_v51 = vshll.u32 %v1479_v32, 16  ;;  %v1030_v1 = vld [vmem:[#allocation2 + $0xc] sm:$0xe] }
  0x39   : > { %v390_v15 = vsel %vm372_vm14, %v381_v60, %v343_v0  ;;  %1575 = vmatprep.subr.bf16.mxu0 %v1694_v2  ;;  %1555 = vmatprep.mubr.msk.bf16.mxu0 %vm1697_vm3, %v1694_v2  ;;  %v1058_v7 = vshrl.u32 %v1479_v32, 16  ;;  %v832_v60 = vsel %vm830_vm2, %v1682_v26, 0  ;;  %v1484_v32 = vcombine.low %v1030_v1, %v2007_v19 }
  0x3a   : > { %526 = vst.msk [vmem:[#allocation2 + $0x20] sm:$0xf] %vm418_vm0, %v1503_v12  ;;  %v1504_v55 = vpack.c.bf16 %v481_v37, %v481_v37  ;;  %vm399_vm15 = vcmp.lt.s32.totalorder %v390_v15, 8  ;;  %1531 = vmatprep.mubr.msk.bf16.mxu1 %vm1697_vm3, %v1694_v2  ;;  %v1062_v0 = vrot.slane %v1060_v51, 1  ;;  %1530 = vmatpush3.bf16.msra.mxu1 %v832_v60  ;;  %v2100_v60 = vld [vmem:[#allocation2 + $0x2c] sm:$0xf] }
  0x3b   : > { %726 = vrot.lane.b32.xlu0 %v717_v14, %s1695_s30  ;;  %v535_v20 = vld [vmem:[#allocation2 + $0x18] sm:$0xf]  ;;  %v536_v22 = vld [vmem:[#allocation2 + $0x1c] sm:$0xf]  ;;  %v2010_v23 = vsel %vm399_vm15, 1.0, %v1694_v2  ;;  %1599 = vmatprep.subr.bf16.mxu1 %v1694_v2  ;;  %vm814_vm7 = vcmask 195584  }
  0x3c   : > { %v2012_v24 = vcombine.low %v535_v20, %v536_v22  ;;  %v2015_v25 = vcombine.low %v1900_v21, %v535_v20  ;;  %527 = vst.msk [vmem:[#allocation2 + $0x24] sm:$0xf] %vm418_vm0, %v1504_v55  ;;  %v482_v14 = vmul.f32 %v2010_v23, %v473_v13  ;;  %v2061_v27 = vld [vmem:[#allocation2 + $0x14] sm:$0xff]   ;;  %vm765_vm8 = vsmask.f32 4352 }
  0x3d   : > { %v1065_v15 = vshll.u32 %v2061_v27, 16  ;;  %v1069_v51 = vshrl.u32 %v2061_v27, 16 }
  0x3e   : > { %v627_v34 = vrot.slane %v2015_v25, 5  ;;  %v720_v35 = vrot.slane %v2012_v24, 5  ;;  %v593_v21 = vshll.u32 %v2012_v24, 16  ;;  %v597_v36 = vshrl.u32 %v2012_v24, 16 }
  0x3f   : > { %v1505_v38 = vpack.c.bf16 %v482_v14, %v482_v14 }
  0x40   : > { %v628_v16 = vsel %vm623_vm4, %v625_v8, %v627_v34  ;;  %v595_v42 = vrot.slane %v593_v21, 1  ;;  %v687_v41 = vrot.slane %v597_v36, 4  ;;  %v688_v48 = vrot.slane %v593_v21, 5 }
  0x41   : > { %637 = vrot.lane.b32.xlu1 %v628_v16, %s1695_s30  ;;  %v2040_v47 = vld [vmem:[#allocation2 + $0x20] sm:$0xf]  ;;  %528 = vst.msk [vmem:[#allocation2 + $0x28] sm:$0xf] %vm418_vm0, %v1505_v38  ;;  %v721_v8 = vsel %vm623_vm4, %v718_v17, %v720_v35  ;;  %v1063_v21 = vor.u32 %v1062_v0, %v1058_v7  ;;  %vm1109_vm0 = vcmask 1046528  }
  0x42   : > { %v596_v49 = vsel %vm568_vm5, %v591_v29, %v595_v42  ;;  %v2048_v50 = vcombine.low %v536_v22, %v2040_v47  ;;  %v689_v56 = vor.u32 %v688_v48, %v687_v41  ;;  %v599_v31 = vor.u32 %v597_v36, %v595_v42  ;;  %v1675_v38 = vld [vmem:[#allocation2 + $0x1c] sm:$0xff]  }
  0x43   : > { %612 = vrot.lane.b32.xlu0 %v596_v49, %s1696_s6  ;;  %v2051_v57 = vld [vmem:[#allocation2 + $0x24] sm:$0xf]  ;;  %v1067_v36 = vrot.slane %v1065_v15, 1  ;;  %v1111_v49 = vrot.slane %v2061_v27, 1  ;;  %v1077_v0 = vshrl.u32 %v1675_v38, 16 }
  0x44   : > { %v629_v54 = vrot.slane %v2048_v50, 5  ;;  %v2059_v17 = vcombine.low %v2040_v47, %v2051_v57  ;;  %v690_v28 = vsel %vm679_vm6, %v1948_v40, %v689_v56  ;;  %v1029_v27 = vld [vmem:[#allocation2 + $0x30] sm:$0x1] }
  0x45   : > { %730 = vrot.lane.b32.xlu1 %v721_v8, %s1695_s30  ;;  %v1110_v8 = vrot.slane %v1484_v32, 1  ;;  %v1068_v19 = vsel %vm568_vm5, %v1063_v21, %v1067_v36 }
  0x46   : > { %v630_v45 = vsel %vm623_vm4, %v627_v34, %v629_v54  ;;  %v722_v46 = vrot.slane %v2059_v17, 5  ;;  %v601_v52 = vshll.u32 %v2059_v17, 16  ;;  %v605_v58 = vshrl.u32 %v2059_v17, 16 }
  0x47   : > { %708 = vrot.lane.b32.xlu0 %v690_v28, %s1696_s6 }
  0x48   : > { %v2074_v40 = vrot.slane %v601_v52, 1  ;;  %v670_v12 = vld [vmem:[#allocation2 + $0x28] sm:$0xf]  ;;  %v691_v37 = vrot.slane %v605_v58, 4  ;;  %v692_v13 = vrot.slane %v601_v52, 5  ;;  %v723_v55 = vsel %vm623_vm4, %v720_v35, %v722_v46 }
  0x49   : > { %639 = vrot.lane.b32.xlu1 %v630_v45, %s1695_s30  ;;  %v1459_v39 = vcombine.low %v670_v12, %v670_v12  ;;  %v1460_v29 = vcombine.low %v670_v12, %v671_v59  ;;  %v2089_v42 = vcombine.low %v2051_v57, %v670_v12  ;;  %v1676_v26 = vld [vmem:[#allocation2 + $0x24] sm:$0xff]   ;;  %v1112_v45 = vsel %vm1109_vm0, %v1110_v8, %v1111_v49 }
  0x4a   : > { %v604_v18 = vsel %vm568_vm5, %v599_v31, %v2074_v40  ;;  %v693_v20 = vor.u32 %v692_v13, %v691_v37  ;;  %v1113_v52 = vrot.slane %v1675_v38, 1  ;;  %v1071_v59 = vor.u32 %v1069_v51, %v1067_v36 }
  0x4b   : > { %614 = vrot.lane.b32.xlu0 %v604_v18, %s1696_s6  ;;  %v696_v22 = vshrl.u32 %v1459_v39, 16  ;;  %v699_v14 = vshll.u32 %v1459_v39, 16  ;;  %v724_v48 = vrot.slane %v1460_v29, 5  ;;  %v1081_v1 = vshll.u32 %v1676_v26, 16 }
  0x4c   : > { %v694_v34 = vsel %vm679_vm6, %v689_v56, %v693_v20  ;;  %v1073_v56 = vshll.u32 %v1675_v38, 16  ;;  %v1114_v12 = vsel %vm1109_vm0, %v1111_v49, %v1113_v52  ;;  %v1115_v37 = vrot.slane %v1676_v26, 1  ;;  %v669_v49 = vld [vmem:[#allocation2 + $0x4] sm:$0x8] }
  0x4d   : > { %732 = vrot.lane.b32.xlu1 %v723_v55, %s1695_s30  ;;  %v698_v16 = vrot.slane %v696_v22, 4  ;;  %v701_v35 = vrot.slane %v699_v14, 5  ;;  %v725_v31 = vsel %vm623_vm4, %v722_v46, %v724_v48  ;;  %v1456_v46 = vcombine.low %v2051_v57, %v2051_v57 }
  0x4e   : > { %v1075_v7 = vrot.slane %v1073_v56, 1  ;;  %v1083_v39 = vrot.slane %v1081_v1, 1  ;;  %v1483_v55 = vcombine.low %v2100_v60, %v1029_v27  ;;  %v1116_v18 = vsel %vm1109_vm0, %v1113_v52, %v1115_v37  ;;  %v1681_v1 = vld [vmem:[%s2306_s3 + $0x18] sm:$0xff]  }
  0x4f   : > { %v702_v41 = vor.u32 %v701_v35, %v698_v16  ;;  %710 = vrot.lane.b32.xlu0 %v694_v34, %s1696_s6  ;;  %v1085_v14 = vshrl.u32 %v1676_v26, 16  ;;  %v607_v57 = vor.u32 %v605_v58, %v2074_v40  ;;  %v1457_v56 = vcombine.low %v669_v49, %v1885_v53 }
  0x50   : > { %v1076_v13 = vsel %vm568_vm5, %v1071_v59, %v1075_v7  ;;  %v1079_v15 = vor.u32 %v1077_v0, %v1075_v7  ;;  %v1089_v29 = vshll.u32 %v1483_v55, 16  ;;  %v1117_v34 = vrot.slane %v1483_v55, 1 }
  0x51   : > { %v703_v28 = vsel %vm679_vm6, %v693_v20, %v702_v41  ;;  %v631_v20 = vrot.slane %v1456_v46, 5  ;;  %v1087_v21 = vor.u32 %v1085_v14, %v1083_v39  ;;  %v1093_v16 = vshrl.u32 %v1483_v55, 16 }
  0x52   : > { %712 = vrot.lane.b32.xlu1 %v703_v28, %s1696_s6  ;;  %v1084_v22 = vsel %vm568_vm5, %v1079_v15, %v1083_v39  ;;  %v1091_v36 = vrot.slane %v1089_v29, 1  ;;  %v1118_v38 = vsel %vm1109_vm0, %v1115_v37, %v1117_v34  ;;  %vm655_vm6 = vcmask 130048  }
  0x53   : > { %1096 = vrot.lane.b32.xlu0 %v1068_v19, %s1696_s6  ;;  %v632_v32 = vsel %vm623_vm4, %v629_v54, %v631_v20  ;;  %vm643_vm4 = vcmask 64512  }
  0x54   : > { %v1092_v35 = vsel %vm568_vm5, %v1087_v21, %v1091_v36  ;;  %v1095_v17 = vor.u32 %v1093_v16, %v1091_v36  ;;  %vm911_vm5 = vcmask 1044480  }
  0x56   : > { %734 = vrot.lane.b32.xlu1 %v725_v31, %s1695_s30 }
  0x57   : > { %1119 = vrot.lane.b32.xlu0 %v1112_v45, %s1695_s30 }
  0x5a   : > { %1121 = vrot.lane.b32.xlu1 %v1114_v12, %s1695_s30  ;;  %v1683_v12 = vld [vmem:[%s2306_s3 + $0x20] ss:$0 sps:$4 sm:$0xff]  }
  0x5b   : > { %1098 = vrot.lane.b32.xlu0 %v1076_v13, %s1696_s6  ;;  %v1174_v20 = vsel %vm830_vm2, %v1683_v12, 0 }
  0x5e   : > { %1123 = vrot.lane.b32.xlu1 %v1116_v18, %s1695_s30 }
  0x5f   : > { %1100 = vrot.lane.b32.xlu0 %v1084_v22, %s1696_s6 }
  0x62   : > { %641 = vrot.lane.b32.xlu1 %v632_v32, %s1695_s30 }
  0x63   : > { %616 = vrot.lane.b32.xlu0 %v607_v57, %s1696_s6 }
  0x66   : > { %1125 = vrot.lane.b32.xlu1 %v1118_v38, %s1695_s30 }
  0x67   : > { %1102 = vrot.lane.b32.xlu0 %v1092_v35, %s1696_s6 }
  0x6a   : > { %1127 = vrot.lane.b32.xlu1 %v1117_v34, %s1695_s30 }
  0x6b   : > { %1104 = vrot.lane.b32.xlu0 %v1095_v17, %s1696_s6 }
  0x9d   : > { %v634_v54 = vpop.permute.xlu1 %633 }
  0xa1   : > { %v636_v58 = vpop.permute.xlu1 %635  ;;  %v609_v40 = vpop.permute.xlu0 %608 }
  0xa2   : > { %v645_v8 = vsel %vm643_vm4, %v1811_v43, %v609_v40 }
  0xa3   : > { %v657_v51 = vsel %vm655_vm6, %v645_v8, %v634_v54 }
  0xa4   : > { %v912_v43 = vrot.slane %v657_v51, 3 }
  0xa5   : > { %v707_v41 = vpop.permute.xlu1 %706  ;;  %v705_v48 = vpop.permute.xlu0 %704 }
  0xa6   : > { %v741_v19 = vsel %vm643_vm4, %v1902_v61, %v707_v41  ;;  %v738_v53 = vsel %vm643_vm4, %v1457_v56, %v705_v48 }
  0xa9   : > { %v729_v26 = vpop.permute.xlu1 %728  ;;  %v611_v28 = vpop.permute.xlu0 %610 }
  0xaa   : > { %v754_v31 = vsel %vm655_vm6, %v741_v19, %v729_v26  ;;  %v647_v45 = vsel %vm643_vm4, %v1905_v62, %v611_v28 }
  0xab   : > { %v773_v52 = vshrl.u32 %v754_v31, 16  ;;  %v776_v59 = vshll.u32 %v754_v31, 16  ;;  %v659_v7 = vsel %vm655_vm6, %v647_v45, %v636_v58 }
  0xac   : > { %v913_v0 = vrot.slane %v659_v7, 3 }
  0xad   : > { %v727_v27 = vpop.permute.xlu0 %726  ;;  %v775_v46 = vrot.slane %v773_v52, 3  ;;  %v778_v13 = vrot.slane %v776_v59, 4 }
  0xae   : > { %v752_v62 = vsel %vm655_vm6, %v738_v53, %v727_v27  ;;  %v914_v37 = vsel %vm911_vm5, %v912_v43, %v913_v0 }
  0xaf   : > { %v766_v15 = vshrl.u32 %v752_v62, 16  ;;  %v769_v39 = vshll.u32 %v752_v62, 16  ;;  %1556 = vmatmul.mubr.msk.bf16.vlgmr.msra.gmra.mrb[0].mxu0 %vm814_vm7, %v914_v37  ;;  %v779_v22 = vor.u32 %v778_v13, %v775_v46 }
  0xb0   : > { %1576 = vmatpush3.bf16.msra.mxu0 %v1681_v1  ;;  %1559 = vmatprep.mubr.msk.bf16.mxu0 %vm1697_vm3, %v1694_v2 }
  0xb1   : > { %v768_v55 = vrot.slane %v766_v15, 3  ;;  %v771_v18 = vrot.slane %v769_v39, 4  ;;  %1577 = vmatprep.subr.bf16.mxu0 %v1694_v2 }
  0xb3   : > { %v772_v14 = vor.u32 %v771_v18, %v768_v55  ;;  %v638_v29 = vpop.permute.xlu1 %637 }
  0xb4   : > { %1578 = vmatpush3.bf16.msra.mxu0 %v1174_v20 }
  0xb5   : > { %v780_v57 = vsel %vm765_vm8, %v772_v14, %v779_v22  ;;  %v613_v32 = vpop.permute.xlu0 %612 }
  0xb6   : > { %1532 = vmatmul.mubr.msk.bf16.vlgmr.msra.gmra.mrb[0].mxu1 %vm814_vm7, %v780_v57  ;;  %v649_v34 = vsel %vm643_vm4, %v1913_v30, %v613_v32  ;;  %v538_v32 = vld [vmem:[#allocation2 + $0x24] sm:$0x7] }
  0xb7   : > { %1601 = vmatpush3.bf16.msra.mxu1 %v1893_v11  ;;  %1535 = vmatprep.mubr.msk.bf16.mxu1 %vm1697_vm3, %v1694_v2  ;;  %v731_v21 = vpop.permute.xlu1 %730  ;;  %v661_v36 = vsel %vm655_vm6, %v649_v34, %v638_v29 }
  0xb8   : > { %1600 = vmatprep.subr.bf16.mxu1 %v1694_v2  ;;  %v915_v38 = vrot.slane %v661_v36, 3  ;;  %v1450_v36 = vcombine.low %v2040_v47, %v538_v32 }
  0xb9   : > { %v709_v16 = vpop.permute.xlu0 %708 }
  0xba   : > { %v744_v35 = vsel %vm643_vm4, %v2015_v25, %v709_v16  ;;  %v916_v17 = vsel %vm911_vm5, %v913_v0, %v915_v38 }
  0xbb   : > { %1602 = vmatpush3.bf16.msra.mxu1 %v2024_v33  ;;  %v640_v30 = vpop.permute.xlu1 %639  ;;  %v756_v11 = vsel %vm655_vm6, %v744_v35, %v731_v21  ;;  %1560 = vmatmul.mubr.msk.bf16.gmra.mrb[4].mxu0 %vm814_vm7, %v916_v17 }
  0xbc   : > { %v781_v54 = vshrl.u32 %v756_v11, 16  ;;  %v784_v58 = vshll.u32 %v756_v11, 16  ;;  %1563 = vmatprep.mubr.msk.bf16.mxu0 %vm1697_vm3, %v1694_v2 }
  0xbd   : > { %v615_v40 = vpop.permute.xlu0 %614 }
  0xbe   : > { %v783_v41 = vrot.slane %v781_v54, 3  ;;  %v786_v48 = vrot.slane %v784_v58, 4  ;;  %v651_v8 = vsel %vm643_vm4, %v2012_v24, %v615_v40  ;;  %v1478_v40 = vcombine.low %v2100_v60, %v2100_v60 }
  0xbf   : > { %v733_v49 = vpop.permute.xlu1 %732  ;;  %v2173_v19 = vsel %vm655_vm6, %v651_v8, %v640_v30 }
  0xc0   : > { %v787_v33 = vor.u32 %v786_v48, %v783_v41  ;;  %v917_v51 = vrot.slane %v2173_v19, 3 }
  0xc1   : > { %v711_v56 = vpop.permute.xlu0 %710 }
  0xc2   : > { %v747_v26 = vsel %vm643_vm4, %v2048_v50, %v711_v56  ;;  %v788_v28 = vsel %vm765_vm8, %v779_v22, %v787_v33  ;;  %v918_v31 = vsel %vm911_vm5, %v915_v38, %v917_v51 }
  0xc3   : > { %v758_v45 = vsel %vm655_vm6, %v747_v26, %v733_v49  ;;  %1536 = vmatmul.mubr.msk.bf16.gmra.mrb[4].mxu1 %vm814_vm7, %v788_v28  ;;  %1564 = vmatmul.mubr.msk.bf16.gmra.mrb[8].mxu0 %vm814_vm7, %v918_v31 }
  0xc4   : > { %v713_v24 = vpop.permute.xlu1 %712  ;;  %v789_v52 = vshrl.u32 %v758_v45, 16  ;;  %v792_v59 = vshll.u32 %v758_v45, 16  ;;  %1539 = vmatprep.mubr.msk.bf16.mxu1 %vm1697_vm3, %v1694_v2  ;;  %1579 = vmatprep.mubr.msk.bf16.mxu0 %vm1697_vm3, %v1694_v2 }
  0xc5   : > { %v1097_v7 = vpop.permute.xlu0 %1096  ;;  %v750_v43 = vsel %vm643_vm4, %v2089_v42, %v713_v24 }
  0xc6   : > { %v791_v0 = vrot.slane %v789_v52, 3  ;;  %v794_v1 = vrot.slane %v792_v59, 4  ;;  %v1130_v62 = vsel %vm643_vm4, %v1902_v61, %v1097_v7 }
  0xc8   : > { %v795_v53 = vor.u32 %v794_v1, %v791_v0  ;;  %v735_v27 = vpop.permute.xlu1 %734 }
  0xc9   : > { %v760_v12 = vsel %vm655_vm6, %v750_v43, %v735_v27  ;;  %v1120_v37 = vpop.permute.xlu0 %1119 }
  0xca   : > { %v797_v46 = vshrl.u32 %v760_v12, 16  ;;  %v800_v13 = vshll.u32 %v760_v12, 16  ;;  %v1141_v15 = vsel %vm655_vm6, %v1130_v62, %v1120_v37  ;;  %v796_v39 = vsel %vm765_vm8, %v787_v33, %v795_v53 }
  0xcb   : > { %1540 = vmatmul.mubr.msk.bf16.gmra.mrb[8].mxu1 %vm814_vm7, %v796_v39  ;;  %1580 = vmatmul.mubr.msk.bf16.vlgmr.msra.gmra.mrb[0].mxu0 %vm814_vm7, %v1141_v15 }
  0xcc   : > { %v799_v55 = vrot.slane %v797_v46, 3  ;;  %v802_v18 = vrot.slane %v800_v13, 4  ;;  %v1122_v20 = vpop.permute.xlu1 %1121  ;;  %1543 = vmatprep.mubr.msk.bf16.mxu1 %vm1697_vm3, %v1694_v2  ;;  %1583 = vmatprep.mubr.msk.bf16.mxu0 %vm1697_vm3, %v1694_v2 }
  0xcd   : > { %v1099_v61 = vpop.permute.xlu0 %1098 }
  0xce   : > { %v803_v22 = vor.u32 %v802_v18, %v799_v55  ;;  %v1132_v14 = vsel %vm643_vm4, %v2015_v25, %v1099_v61 }
  0xcf   : > { %v1143_v29 = vsel %vm655_vm6, %v1132_v14, %v1122_v20 }
  0xd0   : > { %v1124_v34 = vpop.permute.xlu1 %1123  ;;  %v804_v21 = vsel %vm765_vm8, %v795_v53, %v803_v22 }
  0xd1   : > { %v1101_v57 = vpop.permute.xlu0 %1100 }
  0xd2   : > { %v1134_v25 = vsel %vm643_vm4, %v2048_v50, %v1101_v57 }
  0xd3   : > { %1544 = vmatmul.mubr.msk.bf16.gmra.mrb[12].mxu1 %vm814_vm7, %v804_v21  ;;  %1584 = vmatmul.mubr.msk.bf16.gmra.mrb[4].mxu0 %vm814_vm7, %v1143_v29  ;;  %v1145_v16 = vsel %vm655_vm6, %v1134_v25, %v1124_v34 }
  0xd4   : > { %1547 = vmatprep.mubr.msk.bf16.mxu1 %vm1697_vm3, %v1694_v2  ;;  %1587 = vmatprep.mubr.msk.bf16.mxu0 %vm1697_vm3, %v1694_v2  ;;  %v642_v17 = vpop.permute.xlu1 %641 }
  0xd5   : > { %v617_v38 = vpop.permute.xlu0 %616 }
  0xd6   : > { %v654_v35 = vsel %vm643_vm4, %v1450_v36, %v617_v38 }
  0xd7   : > { %v665_v11 = vsel %vm655_vm6, %v654_v35, %v642_v17 }
  0xd8   : > { %v1126_v50 = vpop.permute.xlu1 %1125  ;;  %v919_v54 = vrot.slane %v665_v11, 3 }
  0xd9   : > { %v1103_v30 = vpop.permute.xlu0 %1102 }
  0xda   : > { %v1136_v47 = vsel %vm643_vm4, %v2089_v42, %v1103_v30  ;;  %v920_v41 = vsel %vm911_vm5, %v917_v51, %v919_v54 }
  0xdb   : > { %1548 = vmatmul.mubr.msk.bf16.gmra.mrb[16].mxu1 %vm814_vm7, %v803_v22  ;;  %1588 = vmatmul.mubr.msk.bf16.gmra.mrb[8].mxu0 %vm814_vm7, %v1145_v16  ;;  %v1147_v58 = vsel %vm655_vm6, %v1136_v47, %v1126_v50 }
  0xdc   : > { %1567 = vmatprep.mubr.msk.bf16.mxu1 %vm1697_vm3, %v1694_v2  ;;  %1591 = vmatprep.mubr.msk.bf16.mxu0 %vm1697_vm3, %v1694_v2  ;;  %v1128_v8 = vpop.permute.xlu1 %1127 }
  0xdd   : > { %v1105_v48 = vpop.permute.xlu0 %1104 }
  0xde   : > { %v1139_v42 = vsel %vm643_vm4, %v1478_v40, %v1105_v48 }
  0xdf   : > { %v1149_v60 = vsel %vm655_vm6, %v1139_v42, %v1128_v8 }
  0xe3   : > { %1568 = vmatmul.mubr.msk.bf16.vlgmr.msra.gmra.mrb[12].mxu1 %vm814_vm7, %v920_v41  ;;  %1592 = vmatmul.mubr.msk.bf16.gmra.mrb[12].mxu0 %vm814_vm7, %v1147_v58 }
  0xe4   : > { %1571 = vmatprep.mubr.msk.bf16.mxu1 %vm1697_vm3, %v1694_v2  ;;  %1595 = vmatprep.mubr.msk.bf16.mxu0 %vm1697_vm3, %v1694_v2 }
  0xeb   : > { %1572 = vmatmul.mubr.msk.bf16.gmra.mrb[16].mxu1 %vm814_vm7, %v919_v54  ;;  %1596 = vmatmul.mubr.msk.bf16.gmra.mrb[16].mxu0 %vm814_vm7, %v1149_v60 }
 0x189   : > { %v868_v49 = vpop.f32.mrb[0].mxu1 }
 0x18a   : > { %v1533_v19 = vpop.f32.mrb[1].mxu1 }
 0x18b   : > { %v871_v33 = vpop.f32.mrb[2].mxu1 }
 0x18c   : > { %v1534_v51 = vpop.f32.mrb[3].mxu1 }
 0x196   : > { %v876_v56 = vpop.f32.mrb[4].mxu1 }
 0x197   : > { %v1537_v26 = vpop.f32.mrb[5].mxu1 }
 0x198   : > { %v879_v28 = vpop.f32.mrb[6].mxu1 }
 0x199   : > { %v1538_v31 = vpop.f32.mrb[7].mxu1 }
 0x19e   : > { %v884_v45 = vpop.f32.mrb[8].mxu1  ;;  %v1210_v2 = vpop.f32.mrb[0].mxu0 }
 0x19f   : > { %v1603_v24 = vadd.f32 %v1210_v2, %v868_v49  ;;  %v1541_v52 = vpop.f32.mrb[9].mxu1  ;;  %v1581_v59 = vpop.f32.mrb[1].mxu0 }
 0x1a0   : > { %v887_v7 = vpop.f32.mrb[10].mxu1  ;;  %v1213_v43 = vpop.f32.mrb[2].mxu0 }
 0x1a1   : > { %1257 = vst.msk [vmem:[%s2247_s22] sm:$0xff] %vm643_vm4, %v1603_v24  ;;  %v1266_v0 = vmul.f32 %v1603_v24, %v1821_v4  ;;  %v1604_v1 = vadd.f32 %v1213_v43, %v871_v33  ;;  %v1542_v53 = vpop.f32.mrb[11].mxu1  ;;  %v1582_v27 = vpop.f32.mrb[3].mxu0 }
 0x1a3   : > { %v1299_v12 = vmul.f32 %v1603_v24, %v1266_v0  ;;  %1258 = vst.msk [vmem:[%s2247_s22 + $0x8] sm:$0xff] %vm643_vm4, %v1604_v1  ;;  %v1267_v62 = vmul.f32 %v1604_v1, %v1824_v5  ;;  %v1275_v37 = vsel %vm643_vm4, %v1266_v0, 0.0 }
 0x1a5   : > { %v1276_v46 = vsel %vm643_vm4, %v1267_v62, 0.0  ;;  %v1300_v13 = vmul.f32 %v1604_v1, %v1267_v62  ;;  %v1308_v55 = vsel %vm643_vm4, %v1299_v12, 0.0 }
 0x1a6   : > { %v1277_v15 = vadd.f32 %v1276_v46, %v1275_v37  ;;  %v1218_v39 = vpop.f32.mrb[4].mxu0 }
 0x1a7   : > { %v1309_v4 = vsel %vm643_vm4, %v1300_v13, 0.0  ;;  %v1605_v18 = vadd.f32 %v1218_v39, %v876_v56  ;;  %v1585_v20 = vpop.f32.mrb[5].mxu0 }
 0x1a8   : > { %v1310_v61 = vadd.f32 %v1309_v4, %v1308_v55  ;;  %v1221_v22 = vpop.f32.mrb[6].mxu0 }
 0x1a9   : > { %1259 = vst.msk [vmem:[%s2247_s22 + $0x10] sm:$0xff] %vm643_vm4, %v1605_v18  ;;  %v1268_v5 = vmul.f32 %v1605_v18, %v1827_v6  ;;  %v1606_v14 = vadd.f32 %v1221_v22, %v879_v28  ;;  %v1586_v29 = vpop.f32.mrb[7].mxu0 }
 0x1ab   : > { %v1278_v57 = vsel %vm643_vm4, %v1268_v5, 0.0  ;;  %v1301_v32 = vmul.f32 %v1605_v18, %v1268_v5  ;;  %1260 = vst.msk [vmem:[%s2247_s22 + $0x18] sm:$0xff] %vm643_vm4, %v1606_v14  ;;  %v1269_v34 = vmul.f32 %v1606_v14, %v1831_v9 }
 0x1ac   : > { %v1279_v21 = vadd.f32 %v1278_v57, %v1277_v15 }
 0x1ad   : > { %v1311_v36 = vsel %vm643_vm4, %v1301_v32, 0.0  ;;  %v1280_v25 = vsel %vm643_vm4, %v1269_v34, 0.0  ;;  %v1302_v38 = vmul.f32 %v1606_v14, %v1269_v34 }
 0x1ae   : > { %v1312_v16 = vadd.f32 %v1311_v36, %v1310_v61  ;;  %v1281_v35 = vadd.f32 %v1280_v25, %v1279_v21  ;;  %v1226_v6 = vpop.f32.mrb[8].mxu0 }
 0x1af   : > { %v1313_v17 = vsel %vm643_vm4, %v1302_v38, 0.0  ;;  %v1607_v30 = vadd.f32 %v1226_v6, %v884_v45  ;;  %v1589_v11 = vpop.f32.mrb[9].mxu0 }
 0x1b0   : > { %v1314_v47 = vadd.f32 %v1313_v17, %v1312_v16  ;;  %v1229_v50 = vpop.f32.mrb[10].mxu0 }
 0x1b1   : > { %1261 = vst.msk [vmem:[%s2247_s22 + $0x20] sm:$0xff] %vm643_vm4, %v1607_v30  ;;  %v1270_v9 = vmul.f32 %v1607_v30, %v1953_v44  ;;  %v1608_v54 = vadd.f32 %v1229_v50, %v887_v7  ;;  %v1590_v58 = vpop.f32.mrb[11].mxu0 }
 0x1b3   : > { %v1282_v40 = vsel %vm643_vm4, %v1270_v9, 0.0  ;;  %v1303_v41 = vmul.f32 %v1607_v30, %v1270_v9  ;;  %1262 = vst.msk [vmem:[%s2247_s22 + $0x28] sm:$0xff] %vm643_vm4, %v1608_v54  ;;  %v1271_v48 = vmul.f32 %v1608_v54, %v1956_v3 }
 0x1b4   : > { %v1283_v42 = vadd.f32 %v1282_v40, %v1281_v35 }
 0x1b5   : > { %v1315_v8 = vsel %vm643_vm4, %v1303_v41, 0.0  ;;  %v1284_v60 = vsel %vm643_vm4, %v1271_v48, 0.0  ;;  %v1304_v49 = vmul.f32 %v1608_v54, %v1271_v48 }
 0x1b6   : > { %v1316_v19 = vadd.f32 %v1315_v8, %v1314_v47  ;;  %v1285_v33 = vadd.f32 %v1284_v60, %v1283_v42  ;;  %v1006_v51 = vpop.f32.mrb[12].mxu1  ;;  %v1234_v44 = vpop.f32.mrb[12].mxu0 }
 0x1b7   : > { %v1317_v56 = vsel %vm643_vm4, %v1304_v49, 0.0  ;;  %v1609_v26 = vadd.f32 %v1234_v44, %v1006_v51  ;;  %v1569_v28 = vpop.f32.mrb[13].mxu1  ;;  %v1593_v31 = vpop.f32.mrb[13].mxu0 }
 0x1b8   : > { %v1318_v45 = vadd.f32 %v1317_v56, %v1316_v19  ;;  %v1009_v2 = vpop.f32.mrb[14].mxu1  ;;  %v1237_v3 = vpop.f32.mrb[14].mxu0 }
 0x1b9   : > { %1263 = vst.msk [vmem:[%s2247_s22 + $0x30] sm:$0xff] %vm643_vm4, %v1609_v26  ;;  %v1272_v24 = vmul.f32 %v1609_v26, %v1985_v63  ;;  %v1610_v52 = vadd.f32 %v1237_v3, %v1009_v2  ;;  %v1570_v59 = vpop.f32.mrb[15].mxu1  ;;  %v1594_v7 = vpop.f32.mrb[15].mxu0 }
 0x1bb   : > { %v1286_v43 = vsel %vm643_vm4, %v1272_v24, 0.0  ;;  %v1305_v0 = vmul.f32 %v1609_v26, %v1272_v24  ;;  %1264 = vst.msk [vmem:[%s2247_s22 + $0x38] sm:$0xff] %vm643_vm4, %v1610_v52  ;;  %v1273_v1 = vmul.f32 %v1610_v52, %v1996_v10 }
 0x1bc   : > { %v1287_v53 = vadd.f32 %v1286_v43, %v1285_v33 }
 0x1bd   : > { %v1319_v27 = vsel %vm643_vm4, %v1305_v0, 0.0  ;;  %v1288_v12 = vsel %vm643_vm4, %v1273_v1, 0.0  ;;  %v1306_v62 = vmul.f32 %v1610_v52, %v1273_v1 }
 0x1be   : > { %v1320_v37 = vadd.f32 %v1319_v27, %v1318_v45  ;;  %v1289_v46 = vadd.f32 %v1288_v12, %v1287_v53  ;;  %v1014_v63 = vpop.f32.mrb[16].mxu1  ;;  %v1242_v13 = vpop.f32.mrb[16].mxu0 }
 0x1bf   : > { %v1321_v15 = vsel %vm643_vm4, %v1306_v62, 0.0  ;;  %v1611_v39 = vadd.f32 %v1242_v13, %v1014_v63  ;;  %v1573_v55 = vpop.f32.mrb[17].mxu1  ;;  %v1597_v4 = vpop.f32.mrb[17].mxu0 }
 0x1c0   : > { %v1322_v18 = vadd.f32 %v1321_v15, %v1320_v37  ;;  %v1017_v20 = vpop.f32.mrb[18].mxu1  ;;  %v1245_v10 = vpop.f32.mrb[18].mxu0 }
 0x1c1   : > { %1265 = vst.msk [vmem:[%s2247_s22 + $0x40] sm:$0xff] %vm643_vm4, %v1611_v39  ;;  %v1274_v61 = vmul.f32 %v1611_v39, %v2010_v23  ;;  %v1574_v22 = vpop.f32.mrb[19].mxu1  ;;  %v1598_v5 = vpop.f32.mrb[19].mxu0 }
 0x1c3   : > { %v1290_v14 = vsel %vm643_vm4, %v1274_v61, 0.0  ;;  %v1307_v29 = vmul.f32 %v1611_v39, %v1274_v61 }
 0x1c4   : > { %v1291_v57 = vadd.f32 %v1290_v14, %v1289_v46 }
 0x1c5   : > { %v1323_v32 = vsel %vm643_vm4, %v1307_v29, 0.0 }
 0x1c6   : > { %v1292_v34 = vrot.slane %v1291_v57, 4  ;;  %v1324_v21 = vadd.f32 %v1323_v32, %v1322_v18 }
 0x1c8   : > { %v1293_v36 = vadd.f32 %v1292_v34, %v1291_v57  ;;  %v1325_v25 = vrot.slane %v1324_v21, 4 }
 0x1ca   : > { %v1294_v38 = vrot.slane %v1293_v36, 2  ;;  %v1326_v16 = vadd.f32 %v1325_v25, %v1324_v21 }
 0x1cc   : > { %v1295_v35 = vadd.f32 %v1294_v38, %v1293_v36  ;;  %v1327_v6 = vrot.slane %v1326_v16, 2 }
 0x1ce   : > { %v1296_v17 = vrot.slane %v1295_v35, 1  ;;  %v1328_v30 = vadd.f32 %v1327_v6, %v1326_v16 }
 0x1d0   : > { %v1297_v23 = vadd.f32 %v1296_v17, %v1295_v35  ;;  %v1329_v11 = vrot.slane %v1328_v30, 1 }
 0x1d2   : > { %1298 = vst.msk [vmem:[%s235_s25] sm:$0x1] %vm422_vm1, %v1297_v23  ;;  %v1330_v47 = vadd.f32 %v1329_v11, %v1328_v30 }
 0x1d4   : > { %1331 = vst.msk [vmem:[%s235_s25 + $0x1] sm:$0x1] %vm422_vm1, %v1330_v47 }
 0x1d5 PF: > { %s16_s18 = sadd.s32 1, %s1691_s18  }
 0x1d6   : > { %p13_p4 = scmp.ge.s32.totalorder %s16_s18, 4  }
 0x1d8   :  { %15 = sbr.rel (!%p13_p4) target bundleno = 1 (0x1), region = 80 }

// kernel: basic_block_forward.3
= control target key start
LH: loop header
LB: loop body
LE: loop exit
PB: predicated region body
PF: predicated region fallthrough
CT: control target
= control target key end

     0   :  { %s1945_s18 = smov 0   ;;  %s2571_s0 = inlined_call_operand.vmem [shape: bf16[2,4,82,4], index: 0, kind: input, shape index: {}]   ;;  %s2572_s1 = inlined_call_operand.vmem [shape: bf16[3,12,8], index: 1, kind: input, shape index: {}]   ;;  %s2573_s2 = inlined_call_operand.vmem [shape: bf16[4,8], index: 2, kind: input, shape index: {}]   ;;  %s2574_s3 = inlined_call_operand.vmem [shape: f32[2,72,8], index: 3, kind: output, shape index: {0}]   ;;  %s2575_s4 = inlined_call_operand.vmem [shape: f32[2,72,8], index: 4, kind: output, shape index: {1}]   ;;  %s2576_s5 = inlined_call_operand.vmem [shape: f32[2,4,8], index: 5, kind: output, shape index: {2}]  }
   0x1 LB: > { %s1576_s19 = sadd.s32 4294967295, %s1909_s18   ;;  %p1580_p0 = scmp.ge.s32.totalorder %s1909_s18, 1  ;;  %s1909_s18 = sphi %s1945_s18, %s16_s18  }
   0x2   : > { %p192_p1 = scmp.lt.s32.totalorder %s1909_s18, 3 }
   0x4   : > { %p193_p2 = pnand %p1580_p0, %p192_p1 }
   0x5   : > { %p229_p3 = scmp.lt.s32.totalorder (!%p193_p2), %s1576_s19, 1  ;;  %v1911_v0 = vmov (!%p193_p2), 0.0   ;;  %vm753_vm0 = vcmask (!%p193_p2), 1045504   ;;  %v1897_v1 = vld [vmem:[%s2572_s1 + $0x8] sm:$0x3f] (!%p193_p2)   ;;  %vm1912_vm1 = vmmov (!%p193_p2), 0  }
   0x6   : > { %196 = sbr.rel (%p193_p2) target bundleno = 453 (0x1c5), region = 32  ;;  %1718 = vmatprep.subr.bf16.mxu1 (!%p193_p2), %v1911_v0  ;;  %1740 = vmatprep.subr.bf16.mxu0 (!%p193_p2), %v1911_v0  ;;  %v1898_v2 = vld [vmem:[%s2572_s1] sm:$0x3f] (!%p193_p2)   ;;  %v755_v3 = vsel (!%p193_p2), %vm753_vm0, %v1897_v1, 0  ;;  %s1913_s28 = smov (!%p193_p2), 4   ;;  %vm559_vm3 = vcmask (!%p193_p2), 31744  }
   0x7   : > { %1719 = vmatpush3.bf16.msra.mxu1 (!%p193_p2), %v755_v3  ;;  %v845_v4 = vsel (!%p193_p2), %vm753_vm0, %v1898_v2, 0  ;;  %1720 = vmatprep.mubr.msk.bf16.mxu1 (!%p193_p2), %vm1912_vm1, %v1911_v0  ;;  %vm509_vm2 = vsmask.f32 (!%p193_p2), 7424  ;;  %s1914_s29 = smov (!%p193_p2), 8   ;;  %vm1230_vm4 = vcmask (!%p193_p2), 1041408   ;;  %vm571_vm5 = vcmask (!%p193_p2), 64512  }
   0x8   : > { %1741 = vmatpush3.bf16.msra.mxu0 (!%p193_p2), %v845_v4  ;;  %1784 = vmatprep.subr.bf16.mxu1 (!%p193_p2), %v1911_v0  ;;  %vm742_vm6 = vcmask (!%p193_p2), 97280  }
   0x9   : > { %1762 = vmatprep.subr.bf16.mxu0 (!%p193_p2), %v1911_v0  ;;  %1742 = vmatprep.mubr.msk.bf16.mxu0 (!%p193_p2), %vm1912_vm1, %v1911_v0 }
   0xd   : > { %s2606_s19 = smov (!%p229_p3, %s1576_s19), 1 }
   0xe   : > { %s1835_s24 = smul.u32 176, %s2606_s19  ;;  %s1584_s16 = sshll.u32 %s2606_s19, 2 }
   0xf   : > { %s1836_s9 = smul.u32 72, %s2606_s19  ;;  %s247_s21 = scalar_lea.vmem %s2576_s5, %s1584_s16 }
  0x10   : > { %s1969_s27 = scalar_lea.vmem %s2571_s0, %s1835_s24 }
  0x11   : > { %v1867_v5 = vld [vmem:[%s1969_s27 + $0x2c] sm:$0xff]   ;;  %v1975_v6 = vld [vmem:[%s1969_s27 + $0x84] sm:$0xff]   ;;  %v1869_v7 = vld [vmem:[%s1969_s27 + $0x34] sm:$0xff]   ;;  %s2371_s12 = scalar_lea.vmem %s2575_s4, %s1836_s9  ;;  %s2393_s15 = scalar_lea.vmem %s2574_s3, %s1836_s9 }
  0x12   : > { %496 = vrot.lane.b32.xlu0 %v1867_v5, %s1913_s28  ;;  %651 = vrot.lane.b32.xlu1 %v1975_v6, %s1913_s28  ;;  %v1986_v8 = vld [vmem:[%s1969_s27 + $0x58] sm:$0xff]   ;;  %v1989_v9 = vld [vmem:[%s1969_s27 + $0x60] sm:$0xff]  }
  0x13   : > { %v665_v10 = vshrl.u32 %v1986_v8, 16  ;;  %v667_v11 = vshll.u32 %v1986_v8, 16  ;;  %v672_v12 = vshll.u32 %v1989_v9, 16  ;;  %v1996_v13 = vld [vmem:[%s1969_s27] sm:$0xff]   ;;  %v1999_v14 = vld [vmem:[%s1969_s27 + $0x8] sm:$0xff]   ;;  %v676_v15 = vshrl.u32 %v1989_v9, 16 }
  0x14   : > { %v511_v18 = vshrl.u32 %v1996_v13, 16  ;;  %v513_v19 = vshll.u32 %v1996_v13, 16  ;;  %v2005_v20 = vld [vmem:[%s1969_s27 + $0x10] sm:$0xff]   ;;  %v518_v21 = vshll.u32 %v1999_v14, 16  ;;  %v522_v22 = vshrl.u32 %v1999_v14, 16  ;;  %v2011_v27 = vld [vmem:[%s1969_s27 + $0x68] sm:$0xff]  }
  0x15   : > { %v669_v16 = vrot.slane %v667_v11, 1  ;;  %v674_v17 = vrot.slane %v672_v12, 1  ;;  %v526_v25 = vshll.u32 %v2005_v20, 16  ;;  %v680_v32 = vshll.u32 %v2011_v27, 16  ;;  %v2017_v33 = vld [vmem:[%s1969_s27 + $0x18] sm:$0xff]   ;;  %v2024_v38 = vld [vmem:[%s1969_s27 + $0x8c] sm:$0xff]  }
  0x16   : > { %498 = vrot.lane.b32.xlu0 %v1869_v7, %s1913_s28  ;;  %v515_v24 = vrot.slane %v513_v19, 1  ;;  %v520_v26 = vrot.slane %v518_v21, 1  ;;  %v530_v34 = vshrl.u32 %v2005_v20, 16  ;;  %v534_v40 = vshll.u32 %v2017_v33, 16  ;;  %v2028_v41 = vld [vmem:[%s1969_s27 + $0x70] sm:$0xff]   ;;  %v1877_v47 = vld [vmem:[%s1969_s27 + $0x3c] sm:$0xff]  }
  0x17   : > { %v670_v23 = vor.u32 %v669_v16, %v665_v10  ;;  %v528_v30 = vrot.slane %v526_v25, 1  ;;  %v678_v36 = vor.u32 %v676_v15, %v674_v17  ;;  %v682_v39 = vrot.slane %v680_v32, 1  ;;  %v2031_v42 = vld [vmem:[%s1969_s27 + $0x20] sm:$0xf]  ;;  %v449_v45 = vld [vmem:[%s1969_s27 + $0x24] sm:$0x1] }
  0x18   : > { %v516_v29 = vor.u32 %v515_v24, %v511_v18  ;;  %v524_v31 = vor.u32 %v522_v22, %v520_v26  ;;  %v684_v44 = vshrl.u32 %v2011_v27, 16  ;;  %v536_v48 = vrot.slane %v534_v40, 1  ;;  %v2043_v51 = vld [vmem:[%s1969_s27 + $0x78] sm:$0xf]  ;;  %v1632_v52 = vld [vmem:[%s1969_s27 + $0x7c] sm:$0x1] }
  0x19   : > { %v675_v28 = vsel %vm509_vm2, %v670_v23, %v674_v17  ;;  %v532_v43 = vor.u32 %v530_v34, %v528_v30  ;;  %v683_v46 = vsel %vm509_vm2, %v678_v36, %v682_v39  ;;  %v688_v49 = vshll.u32 %v2028_v41, 16  ;;  %v2052_v59 = vld [vmem:[%s1969_s27 + $0x94] sm:$0xff]   ;;  %v2056_v61 = vld [vmem:[%s1969_s27 + $0x8] sm:$0xf]  ;;  %v939_v62 = vld [vmem:[%s1969_s27 + $0x4] sm:$0xe] }
  0x1a   : > { %703 = vrot.lane.b32.xlu1 %v675_v28, %s1914_s29  ;;  %v521_v35 = vsel %vm509_vm2, %v516_v29, %v520_v26  ;;  %v529_v37 = vsel %vm509_vm2, %v524_v31, %v528_v30  ;;  %v1613_v50 = vcombine.low %v2031_v42, %v449_v45  ;;  %v686_v53 = vor.u32 %v684_v44, %v682_v39  ;;  %v1881_v4 = vld [vmem:[%s1969_s27 + $0x44] sm:$0xff]   ;;  %v2069_v12 = vld [vmem:[%s1969_s27 + $0x9c] sm:$0xff]   ;;  %v2072_v15 = vld [vmem:[%s1969_s27 + $0xc] sm:$0xff]  }
  0x1b   : > { %549 = vrot.lane.b32.xlu0 %v521_v35, %s1914_s29  ;;  %v538_v54 = vshrl.u32 %v2017_v33, 16  ;;  %v537_v55 = vsel %vm509_vm2, %v532_v43, %v536_v48  ;;  %v690_v56 = vrot.slane %v688_v49, 1  ;;  %v1643_v58 = vcombine.low %v2043_v51, %v1632_v52  ;;  %v2076_v18 = vld [vmem:[%s1969_s27 + $0x4] sm:$0xf]  ;;  %v1885_v21 = vld [vmem:[%s1969_s27 + $0x4c] ss:$0 sps:$4 sm:$0xff]  }
  0x1c   : > { %v542_v57 = vshll.u32 %v1613_v50, 16  ;;  %v692_v60 = vshrl.u32 %v2028_v41, 16  ;;  %v1678_v5 = vcombine.low %v939_v62, %v2056_v61  ;;  %v546_v17 = vshrl.u32 %v1613_v50, 16  ;;  %v2087_v28 = vld [vmem:[%s1969_s27 + $0x14] sm:$0xff]   ;;  %v2093_v32 = vld [vmem:[%s1969_s27 + $0xa4] ss:$0 sps:$4 sm:$0xff]  }
  0x1d   : > { %v691_v63 = vsel %vm509_vm2, %v686_v53, %v690_v56  ;;  %v540_v1 = vor.u32 %v538_v54, %v536_v48  ;;  %v696_v3 = vshll.u32 %v1643_v58, 16  ;;  %v1668_v22 = vcombine.low %v2076_v18, %v2056_v61  ;;  %v1886_v29 = vld [vmem:[%s1969_s27 + $0x30] sm:$0xff]   ;;  %v1890_v48 = vld [vmem:[%s1969_s27 + $0x38] sm:$0xff]  }
  0x1e   : > { %551 = vrot.lane.b32.xlu1 %v529_v37, %s1914_s29  ;;  %v544_v2 = vrot.slane %v542_v57, 1  ;;  %v694_v10 = vor.u32 %v692_v60, %v690_v56  ;;  %v1006_v16 = vshll.u32 %v1678_v5, 16  ;;  %v1004_v23 = vshrl.u32 %v1678_v5, 16  ;;  %v2098_v37 = vld [vmem:[%s1969_s27 + $0x1c] sm:$0xff]   ;;  %v1894_v60 = vld [vmem:[%s1969_s27 + $0x48] sm:$0xff]  }
  0x1f   : > { %653 = vrot.lane.b32.xlu0 %v2024_v38, %s1913_s28  ;;  %v698_v11 = vrot.slane %v696_v3, 1  ;;  %v1011_v25 = vshll.u32 %v2072_v15, 16  ;;  %v700_v34 = vshrl.u32 %v1643_v58, 16  ;;  %v1015_v35 = vshrl.u32 %v2072_v15, 16 }
  0x20   : > { %v545_v7 = vsel %vm509_vm2, %v540_v1, %v544_v2  ;;  %v1008_v24 = vrot.slane %v1006_v16, 1  ;;  %v548_v26 = vor.u32 %v546_v17, %v544_v2  ;;  %v1019_v36 = vshll.u32 %v2087_v28, 16  ;;  %v1896_v1 = vld [vmem:[%s1969_s27 + $0x50] sm:$0x1f]  }
  0x21   : > { %v699_v19 = vsel %vm509_vm2, %v694_v10, %v698_v11  ;;  %v1013_v31 = vrot.slane %v1011_v25, 1  ;;  %v702_v40 = vor.u32 %v700_v34, %v698_v11  ;;  %v1023_v45 = vshrl.u32 %v2087_v28, 16  ;;  %v1899_v10 = vld [vmem:[%s2572_s1 + $0x10] sm:$0x3f]  }
  0x22   : > { %705 = vrot.lane.b32.xlu1 %v683_v46, %s1914_s29  ;;  %v1009_v30 = vor.u32 %v1008_v24, %v1004_v23  ;;  %v1021_v44 = vrot.slane %v1019_v36, 1  ;;  %v1027_v46 = vshll.u32 %v2098_v37, 16  ;;  %v1031_v49 = vshrl.u32 %v2098_v37, 16 }
  0x23   : > { %500 = vrot.lane.b32.xlu0 %v1877_v47, %s1913_s28  ;;  %v1017_v43 = vor.u32 %v1015_v35, %v1013_v31  ;;  %v2107_v47 = vld [vmem:[%s1969_s27 + $0x24] sm:$0x1f]   ;;  %v1131_v24 = vsel %vm753_vm0, %v1899_v10, 0 }
  0x24   : > { %v1014_v39 = vsel %vm509_vm2, %v1009_v30, %v1013_v31  ;;  %v1025_v52 = vor.u32 %v1023_v45, %v1021_v44  ;;  %v1029_v53 = vrot.slane %v1027_v46, 1  ;;  %v1035_v54 = vshll.u32 %v2107_v47, 16 }
  0x25   : > { %v1022_v50 = vsel %vm509_vm2, %v1017_v43, %v1021_v44  ;;  %v1039_v62 = vshrl.u32 %v2107_v47, 16 }
  0x26   : > { %553 = vrot.lane.b32.xlu1 %v537_v55, %s1914_s29  ;;  %v1892_v55 = vld [vmem:[%s1969_s27 + $0x40] sm:$0xff]   ;;  %v1030_v56 = vsel %vm509_vm2, %v1025_v52, %v1029_v53  ;;  %v1033_v57 = vor.u32 %v1031_v49, %v1029_v53  ;;  %v1037_v58 = vrot.slane %v1035_v54, 1  ;;  %v1607_v54 = vcombine.low %v2031_v42, %v2031_v42 }
  0x27   : > { %655 = vrot.lane.b32.xlu0 %v2052_v59, %s1913_s28 }
  0x28   : > { %v1041_v2 = vor.u32 %v1039_v62, %v1037_v58 }
  0x2a   : > { %707 = vrot.lane.b32.xlu1 %v691_v63, %s1914_s29  ;;  %v1038_v63 = vsel %vm509_vm2, %v1033_v57, %v1037_v58  ;;  %v1637_v57 = vcombine.low %v2043_v51, %v2043_v51 }
  0x2b   : > { %502 = vrot.lane.b32.xlu0 %v1881_v4, %s1913_s28 }
  0x2e   : > { %555 = vrot.lane.b32.xlu1 %v545_v7, %s1914_s29  ;;  %v1214_v7 = vld [vmem:[%s2573_s2] sm:$0x3] }
  0x2f   : > { %657 = vrot.lane.b32.xlu0 %v2069_v12, %s1913_s28  ;;  %v1232_v17 = vsel %vm1230_vm4, %v1214_v7, 0 }
  0x32   : > { %709 = vrot.lane.b32.xlu1 %v699_v19, %s1914_s29 }
  0x33   : > { %504 = vrot.lane.b32.xlu0 %v1885_v21, %s1913_s28 }
  0x36   : > { %557 = vrot.lane.b32.xlu1 %v548_v26, %s1914_s29 }
  0x37   : > { %990 = vrot.lane.b32.xlu0 %v1886_v29, %s1913_s28 }
  0x3a   : > { %659 = vrot.lane.b32.xlu1 %v2093_v32, %s1913_s28 }
  0x3b   : > { %1042 = vrot.lane.b32.xlu0 %v1014_v39, %s1914_s29 }
  0x3e   : > { %711 = vrot.lane.b32.xlu1 %v702_v40, %s1914_s29 }
  0x3f   : > { %992 = vrot.lane.b32.xlu0 %v1890_v48, %s1913_s28 }
  0x42   : > { %1044 = vrot.lane.b32.xlu1 %v1022_v50, %s1914_s29 }
  0x43   : > { %994 = vrot.lane.b32.xlu0 %v1892_v55, %s1913_s28 }
  0x46   : > { %1046 = vrot.lane.b32.xlu1 %v1030_v56, %s1914_s29 }
  0x47   : > { %996 = vrot.lane.b32.xlu0 %v1894_v60, %s1913_s28 }
  0x4a   : > { %1048 = vrot.lane.b32.xlu1 %v1038_v63, %s1914_s29 }
  0x4b   : > { %998 = vrot.lane.b32.xlu0 %v1896_v1, %s1913_s28 }
  0x4e   : > { %1050 = vrot.lane.b32.xlu1 %v1041_v2, %s1914_s29 }
  0x84   : > { %v497_v3 = vpop.permute.xlu0 %496  ;;  %v652_v4 = vpop.permute.xlu1 %651 }
  0x85   : > { %v714_v11 = vsel %vm559_vm3, %v1986_v8, %v652_v4  ;;  %v561_v21 = vsel %vm559_vm3, %v1996_v13, %v497_v3 }
  0x88   : > { %v499_v5 = vpop.permute.xlu0 %498 }
  0x89   : > { %v563_v31 = vsel %vm559_vm3, %v1999_v14, %v499_v5 }
  0x8c   : > { %v704_v16 = vpop.permute.xlu1 %703 }
  0x8d   : > { %v725_v19 = vsel %vm571_vm5, %v714_v11, %v704_v16  ;;  %v550_v23 = vpop.permute.xlu0 %549 }
  0x8e   : > { %1721 = vmatmul.mubr.msk.bf16.vlgmr.msra.gmra.mrb[0].mxu1 %vm742_vm6, %v725_v19  ;;  %v573_v25 = vsel %vm571_vm5, %v561_v21, %v550_v23 }
  0x8f   : > { %1724 = vmatprep.mubr.msk.bf16.mxu1 %vm1912_vm1, %v1911_v0  ;;  %1785 = vmatpush3.bf16.msra.mxu1 %v1232_v17 }
  0x90   : > { %1743 = vmatmul.mubr.msk.bf16.vlgmr.msra.gmra.mrb[0].mxu0 %vm742_vm6, %v573_v25  ;;  %v552_v8 = vpop.permute.xlu1 %551 }
  0x91   : > { %1763 = vmatpush3.bf16.msra.mxu0 %v1131_v24  ;;  %1746 = vmatprep.mubr.msk.bf16.mxu0 %vm1912_vm1, %v1911_v0  ;;  %v654_v26 = vpop.permute.xlu0 %653  ;;  %v575_v35 = vsel %vm571_vm5, %v563_v31, %v552_v8 }
  0x92   : > { %v716_v13 = vsel %vm559_vm3, %v1989_v9, %v654_v26 }
  0x94   : > { %v706_v29 = vpop.permute.xlu1 %705 }
  0x95   : > { %v727_v30 = vsel %vm571_vm5, %v716_v13, %v706_v29  ;;  %v501_v34 = vpop.permute.xlu0 %500 }
  0x96   : > { %1725 = vmatmul.mubr.msk.bf16.gmra.mrb[4].mxu1 %vm742_vm6, %v727_v30  ;;  %v565_v14 = vsel %vm559_vm3, %v2005_v20, %v501_v34 }
  0x97   : > { %1728 = vmatprep.mubr.msk.bf16.mxu1 %vm1912_vm1, %v1911_v0 }
  0x98   : > { %1747 = vmatmul.mubr.msk.bf16.gmra.mrb[4].mxu0 %vm742_vm6, %v575_v35  ;;  %v554_v36 = vpop.permute.xlu1 %553 }
  0x99   : > { %1750 = vmatprep.mubr.msk.bf16.mxu0 %vm1912_vm1, %v1911_v0  ;;  %v656_v9 = vpop.permute.xlu0 %655  ;;  %v577_v45 = vsel %vm571_vm5, %v565_v14, %v554_v36 }
  0x9a   : > { %v718_v39 = vsel %vm559_vm3, %v2011_v27, %v656_v9 }
  0x9c   : > { %v708_v40 = vpop.permute.xlu1 %707 }
  0x9d   : > { %v729_v43 = vsel %vm571_vm5, %v718_v39, %v708_v40  ;;  %v503_v44 = vpop.permute.xlu0 %502 }
  0x9e   : > { %1729 = vmatmul.mubr.msk.bf16.gmra.mrb[8].mxu1 %vm742_vm6, %v729_v43  ;;  %v567_v48 = vsel %vm559_vm3, %v2017_v33, %v503_v44 }
  0x9f   : > { %1732 = vmatprep.mubr.msk.bf16.mxu1 %vm1912_vm1, %v1911_v0 }
  0xa0   : > { %1751 = vmatmul.mubr.msk.bf16.gmra.mrb[8].mxu0 %vm742_vm6, %v577_v45  ;;  %v556_v46 = vpop.permute.xlu1 %555 }
  0xa1   : > { %1754 = vmatprep.mubr.msk.bf16.mxu0 %vm1912_vm1, %v1911_v0  ;;  %v658_v27 = vpop.permute.xlu0 %657  ;;  %v579_v53 = vsel %vm571_vm5, %v567_v48, %v556_v46 }
  0xa2   : > { %v720_v20 = vsel %vm559_vm3, %v2028_v41, %v658_v27 }
  0xa4   : > { %v710_v49 = vpop.permute.xlu1 %709 }
  0xa5   : > { %v731_v50 = vsel %vm571_vm5, %v720_v20, %v710_v49  ;;  %v505_v52 = vpop.permute.xlu0 %504 }
  0xa6   : > { %1733 = vmatmul.mubr.msk.bf16.gmra.mrb[12].mxu1 %vm742_vm6, %v731_v50  ;;  %v570_v55 = vsel %vm559_vm3, %v1607_v54, %v505_v52 }
  0xa7   : > { %1736 = vmatprep.mubr.msk.bf16.mxu1 %vm1912_vm1, %v1911_v0 }
  0xa8   : > { %1755 = vmatmul.mubr.msk.bf16.gmra.mrb[12].mxu0 %vm742_vm6, %v579_v53  ;;  %v558_v41 = vpop.permute.xlu1 %557 }
  0xa9   : > { %1758 = vmatprep.mubr.msk.bf16.mxu0 %vm1912_vm1, %v1911_v0  ;;  %v991_v33 = vpop.permute.xlu0 %990  ;;  %v581_v42 = vsel %vm571_vm5, %v570_v55, %v558_v41 }
  0xaa   : > { %v1054_v56 = vsel %vm559_vm3, %v1668_v22, %v991_v33 }
  0xac   : > { %v660_v58 = vpop.permute.xlu1 %659 }
  0xad   : > { %v1043_v60 = vpop.permute.xlu0 %1042  ;;  %v723_v63 = vsel %vm559_vm3, %v1637_v57, %v660_v58 }
  0xae   : > { %v1064_v62 = vsel %vm571_vm5, %v1054_v56, %v1043_v60 }
  0xaf   : > { %v1078_v1 = vshll.u32 %v1064_v62, 16  ;;  %v1076_v5 = vshrl.u32 %v1064_v62, 16 }
  0xb0   : > { %1759 = vmatmul.mubr.msk.bf16.gmra.mrb[16].mxu0 %vm742_vm6, %v581_v42  ;;  %v712_v2 = vpop.permute.xlu1 %711 }
  0xb1   : > { %v733_v3 = vsel %vm571_vm5, %v723_v63, %v712_v2  ;;  %1764 = vmatprep.mubr.msk.bf16.mxu0 %vm1912_vm1, %v1911_v0  ;;  %v993_v51 = vpop.permute.xlu0 %992  ;;  %v1080_v18 = vrot.slane %v1078_v1, 1 }
  0xb2   : > { %1737 = vmatmul.mubr.msk.bf16.gmra.mrb[16].mxu1 %vm742_vm6, %v733_v3  ;;  %v1056_v61 = vsel %vm559_vm3, %v2072_v15, %v993_v51 }
  0xb3   : > { %1786 = vmatprep.mubr.msk.bf16.mxu1 %vm1912_vm1, %v1911_v0  ;;  %v1081_v16 = vor.u32 %v1080_v18, %v1076_v5 }
  0xb4   : > { %v1045_v22 = vpop.permute.xlu1 %1044 }
  0xb5   : > { %v1066_v4 = vsel %vm571_vm5, %v1056_v61, %v1045_v22  ;;  %v995_v10 = vpop.permute.xlu0 %994 }
  0xb6   : > { %v1082_v7 = vshll.u32 %v1066_v4, 16  ;;  %v1058_v11 = vsel %vm559_vm3, %v2087_v28, %v995_v10  ;;  %v1086_v8 = vshrl.u32 %v1066_v4, 16 }
  0xb8   : > { %v1084_v17 = vrot.slane %v1082_v7, 1  ;;  %v1047_v19 = vpop.permute.xlu1 %1046 }
  0xb9   : > { %v1068_v21 = vsel %vm571_vm5, %v1058_v11, %v1047_v19  ;;  %v997_v24 = vpop.permute.xlu0 %996 }
  0xba   : > { %v1085_v15 = vsel %vm509_vm2, %v1081_v16, %v1084_v17  ;;  %v1089_v23 = vshll.u32 %v1068_v21, 16  ;;  %1787 = vmatmul.mubr.msk.bf16.vlgmr.msra.gmra.mrb[20].mxu1 %vm559_vm3, %v1975_v6  ;;  %v1060_v28 = vsel %vm559_vm3, %v2098_v37, %v997_v24  ;;  %v1088_v29 = vor.u32 %v1086_v8, %v1084_v17 }
  0xbb   : > { %1765 = vmatmul.mubr.msk.bf16.vlgmr.msra.gmra.mrb[0].mxu0 %vm742_vm6, %v1085_v15  ;;  %1790 = vmatprep.mubr.msk.bf16.mxu1 %vm1912_vm1, %v1911_v0  ;;  %v1093_v6 = vshrl.u32 %v1068_v21, 16 }
  0xbc   : > { %v1049_v25 = vpop.permute.xlu1 %1048  ;;  %1768 = vmatprep.mubr.msk.bf16.mxu0 %vm1912_vm1, %v1911_v0  ;;  %v1091_v26 = vrot.slane %v1089_v23, 1 }
  0xbd   : > { %v1070_v13 = vsel %vm571_vm5, %v1060_v28, %v1049_v25  ;;  %v999_v30 = vpop.permute.xlu0 %998 }
  0xbe   : > { %v1096_v31 = vshll.u32 %v1070_v13, 16  ;;  %v1092_v34 = vsel %vm509_vm2, %v1088_v29, %v1091_v26  ;;  %v1062_v37 = vsel %vm559_vm3, %v2107_v47, %v999_v30  ;;  %v1095_v36 = vor.u32 %v1093_v6, %v1091_v26 }
  0xbf   : > { %v1100_v14 = vshrl.u32 %v1070_v13, 16 }
  0xc0   : > { %v1051_v35 = vpop.permute.xlu1 %1050  ;;  %v1098_v9 = vrot.slane %v1096_v31, 1 }
  0xc1   : > { %v1072_v39 = vsel %vm571_vm5, %v1062_v37, %v1051_v35 }
  0xc2   : > { %1791 = vmatmul.mubr.msk.bf16.gmra.mrb[24].mxu1 %vm559_vm3, %v2024_v38  ;;  %v1103_v38 = vshll.u32 %v1072_v39, 16  ;;  %v1099_v40 = vsel %vm509_vm2, %v1095_v36, %v1098_v9  ;;  %v1102_v47 = vor.u32 %v1100_v14, %v1098_v9 }
  0xc3   : > { %1769 = vmatmul.mubr.msk.bf16.gmra.mrb[4].mxu0 %vm742_vm6, %v1092_v34  ;;  %1794 = vmatprep.mubr.msk.bf16.mxu1 %vm1912_vm1, %v1911_v0 }
  0xc4   : > { %1772 = vmatprep.mubr.msk.bf16.mxu0 %vm1912_vm1, %v1911_v0  ;;  %v1105_v43 = vrot.slane %v1103_v38, 1 }
  0xc6   : > { %v1106_v44 = vsel %vm509_vm2, %v1102_v47, %v1105_v43 }
  0xca   : > { %1795 = vmatmul.mubr.msk.bf16.gmra.mrb[28].mxu1 %vm559_vm3, %v2052_v59  ;;  %v1107_v59 = vshrl.u32 %v1072_v39, 16 }
  0xcb   : > { %1773 = vmatmul.mubr.msk.bf16.gmra.mrb[8].mxu0 %vm742_vm6, %v1099_v40  ;;  %1798 = vmatprep.mubr.msk.bf16.mxu1 %vm1912_vm1, %v1911_v0 }
  0xcc   : > { %1776 = vmatprep.mubr.msk.bf16.mxu0 %vm1912_vm1, %v1911_v0  ;;  %v1109_v45 = vor.u32 %v1107_v59, %v1105_v43 }
  0xd2   : > { %1799 = vmatmul.mubr.msk.bf16.gmra.mrb[32].mxu1 %vm559_vm3, %v2069_v12  ;;  %v249_v12 = vlaneseq }
  0xd3   : > { %1777 = vmatmul.mubr.msk.bf16.gmra.mrb[12].mxu0 %vm742_vm6, %v1106_v44  ;;  %1802 = vmatprep.mubr.msk.bf16.mxu1 %vm1912_vm1, %v1911_v0 }
  0xd4   : > { %1780 = vmatprep.mubr.msk.bf16.mxu0 %vm1912_vm1, %v1911_v0  ;;  %v2254_v49 = vshrl.u32 %v249_v12, 7 }
  0xd6   : > { %v251_v52 = vadd.s32 8, %v2254_v49  ;;  %v252_v33 = vadd.s32 16, %v2254_v49  ;;  %v253_v56 = vadd.s32 24, %v2254_v49  ;;  %v254_v60 = vadd.s32 32, %v2254_v49 }
  0xd7   : > { %v255_v63 = vadd.s32 40, %v2254_v49  ;;  %v2291_v16 = vadd.s32 48, %v2254_v49  ;;  %v2307_v35 = vadd.s32 56, %v2254_v49 }
  0xd8   : > { %v2267_v57 = vmul.u32.u64.low 3817748708, %v251_v52  ;;  %v2268_v58 = vmul.u32.u64.high 3817748708, %v251_v52, %v2267_v57  ;;  %v2271_v42 = vmul.u32.u64.low 3817748708, %v252_v33  ;;  %v2272_v62 = vmul.u32.u64.high 3817748708, %v252_v33, %v2271_v42 }
  0xd9   : > { %v2275_v1 = vmul.u32.u64.low 3817748708, %v253_v56  ;;  %v2276_v2 = vmul.u32.u64.high 3817748708, %v253_v56, %v2275_v1  ;;  %v2280_v61 = vmul.u32.u64.low 3817748708, %v254_v60  ;;  %v2281_v18 = vmul.u32.u64.high 3817748708, %v254_v60, %v2280_v61 }
  0xda   : > { %1803 = vmatmul.mubr.msk.bf16.gmra.mrb[36].mxu1 %vm559_vm3, %v2093_v32  ;;  %v2262_v32 = vmul.u32.u64.low 3817748708, %v2254_v49  ;;  %v2263_v41 = vmul.u32.u64.high 3817748708, %v2254_v49, %v2262_v32  ;;  %v2286_v5 = vmul.u32.u64.low 3817748708, %v255_v63  ;;  %v2287_v7 = vmul.u32.u64.high 3817748708, %v255_v63, %v2286_v5 }
  0xdb   : > { %1781 = vmatmul.mubr.msk.bf16.gmra.mrb[16].mxu0 %vm742_vm6, %v1109_v45  ;;  %v276_v11 = vshrl.u32 %v2268_v58, 3  ;;  %v287_v19 = vshrl.u32 %v2272_v62, 3  ;;  %v298_v21 = vshrl.u32 %v2276_v2, 3  ;;  %v309_v28 = vshrl.u32 %v2281_v18, 3 }
  0xdc   : > { %v265_v4 = vshrl.u32 %v2263_v41, 3  ;;  %v2299_v25 = vmul.u32.u64.low 3817748708, %v2291_v16  ;;  %v2300_v8 = vmul.u32.u64.high 3817748708, %v2291_v16, %v2299_v25  ;;  %v320_v30 = vshrl.u32 %v2287_v7, 3 }
  0xdd   : > { %v277_v23 = vmul.u32 9, %v276_v11  ;;  %v288_v29 = vmul.u32 9, %v287_v19 }
  0xde   : > { %v266_v17 = vmul.u32 9, %v265_v4  ;;  %v299_v31 = vmul.u32 9, %v298_v21  ;;  %v331_v47 = vshrl.u32 %v2300_v8, 3 }
  0xdf   : > { %v278_v34 = vsub.s32 %v251_v52, %v277_v23  ;;  %v310_v37 = vmul.u32 9, %v309_v28  ;;  %v289_v36 = vsub.s32 %v252_v33, %v288_v29  ;;  %v321_v9 = vmul.u32 9, %v320_v30 }
  0xe0   : > { %v267_v13 = vsub.s32 %v2254_v49, %v266_v17  ;;  %v300_v39 = vsub.s32 %v253_v56, %v299_v31  ;;  %v2315_v43 = vmul.u32.u64.low 3817748708, %v2307_v35  ;;  %v2316_v44 = vmul.u32.u64.high 3817748708, %v2307_v35, %v2315_v43 }
  0xe1   : > { %vm359_vm9 = vcmp.ne.s32.totalorder %v278_v34, 0  ;;  %vm368_vm10 = vcmp.lt.s32.totalorder %v278_v34, 0  ;;  %v311_v40 = vsub.s32 %v254_v60, %v310_v37  ;;  %v386_v59 = vadd.s32 9, %v278_v34 }
  0xe2   : > { %vm358_vm7 = vcmp.ne.s32.totalorder %v267_v13, 0  ;;  %vm367_vm8 = vcmp.lt.s32.totalorder %v267_v13, 0  ;;  %v385_v14 = vadd.s32 9, %v267_v13  ;;  %vm360_vm12 = vcmp.ne.s32.totalorder %v289_v36, 0  ;;  %vm2320_vm14 = vmand %vm368_vm10, %vm359_vm9 }
  0xe3   : > { %vm2309_vm11 = vmand %vm367_vm8, %vm358_vm7  ;;  %vm369_vm13 = vcmp.lt.s32.totalorder %v289_v36, 0  ;;  %v2318_v45 = vsub.s32 %v255_v63, %v321_v9  ;;  %vm361_vm15 = vcmp.ne.s32.totalorder %v300_v39, 0  ;;  %vm370_vm0 = vcmp.lt.s32.totalorder %v300_v39, 0 }
  0xe4   : > { %v394_v52 = vsel %vm2309_vm11, %v385_v14, %v267_v13  ;;  %vm2331_vm1 = vmand %vm369_vm13, %vm360_vm12  ;;  %v388_v33 = vadd.s32 9, %v300_v39  ;;  %vm362_vm2 = vcmp.ne.s32.totalorder %v311_v40, 0  ;;  %vm371_vm3 = vcmp.lt.s32.totalorder %v311_v40, 0 }
  0xe5   : > { %vm2340_vm4 = vmand %vm370_vm0, %vm361_vm15  ;;  %vm363_vm6 = vcmp.ne.s32.totalorder %v2318_v45, 0  ;;  %vm372_vm7 = vcmp.lt.s32.totalorder %v2318_v45, 0  ;;  %vm403_vm8 = vcmp.lt.s32.totalorder %v394_v52, 8  ;;  %v389_v60 = vadd.s32 9, %v311_v40 }
  0xe6   : > { %vm2353_vm9 = vmand %vm371_vm3, %vm362_vm2  ;;  %v390_v2 = vadd.s32 9, %v2318_v45  ;;  %v342_v4 = vshrl.u32 %v2316_v44, 3  ;;  %v1585_v5 = vsel %vm403_vm8, 1.0, %v1911_v0 }
  0xe7   : > { %vm2360_vm11 = vmand %vm372_vm7, %vm363_vm6 }
  0xe8   : > { %v399_v19 = vsel %vm2360_vm11, %v390_v2, %v2318_v45  ;;  %v343_v28 = vmul.u32 9, %v342_v4 }
 0x161   : > { %v2250_v46 = vpop.f32.mrb[0].mxu1 }
 0x162   : > { %v1722_v27 = vpop.f32.mrb[1].mxu1 }
 0x163   : > { %v2252_v20 = vpop.f32.mrb[2].mxu1  ;;  %v2325_v27 = vadd.s32 64, %v2254_v49  ;;  %v395_v49 = vsel %vm2320_vm14, %v386_v59, %v278_v34 }
 0x164   : > { %v1723_v48 = vpop.f32.mrb[3].mxu1  ;;  %vm404_vm10 = vcmp.lt.s32.totalorder %v395_v49, 8 }
 0x165   : > { %v2347_v42 = vmul.u32.u64.low 3817748708, %v2325_v27  ;;  %v2348_v62 = vmul.u32.u64.high 3817748708, %v2325_v27, %v2347_v42 }
 0x167   : > { %v353_v9 = vshrl.u32 %v2348_v62, 3 }
 0x169   : > { %v2256_v50 = vpop.f32.mrb[4].mxu1 }
 0x16a   : > { %v1726_v53 = vpop.f32.mrb[5].mxu1 }
 0x16b   : > { %v2259_v54 = vpop.f32.mrb[6].mxu1  ;;  %v387_v53 = vadd.s32 9, %v289_v36 }
 0x16c   : > { %v1727_v55 = vpop.f32.mrb[7].mxu1 }
 0x16d   : > { %v332_v55 = vmul.u32 9, %v331_v47  ;;  %v396_v63 = vsel %vm2331_vm1, %v387_v53, %v289_v36  ;;  %vm408_vm1 = vcmp.lt.s32.totalorder %v399_v19, 8 }
 0x16e   : > { %vm2374_vm12 = vcmp.lt.s32.totalorder %v396_v63, 8  ;;  %v2438_v41 = vsel %vm408_vm1, 1.0, %v1911_v0 }
 0x16f   : > { %v2365_v18 = vsub.s32 %v2291_v16, %v332_v55  ;;  %v1586_v16 = vsel %vm404_vm10, 1.0, %v1911_v0  ;;  %v1587_v29 = vsel %vm2374_vm12, 1.0, %v1911_v0 }
 0x171   : > { %v2278_v3 = vpop.f32.mrb[8].mxu1  ;;  %vm364_vm14 = vcmp.ne.s32.totalorder %v2365_v18, 0  ;;  %vm373_vm15 = vcmp.lt.s32.totalorder %v2365_v18, 0 }
 0x172   : > { %v1730_v51 = vpop.f32.mrb[9].mxu1  ;;  %vm2420_vm2 = vmand %vm373_vm15, %vm364_vm14 }
 0x173   : > { %v2283_v22 = vpop.f32.mrb[10].mxu1  ;;  %v397_v51 = vsel %vm2340_vm4, %v388_v33, %v300_v39  ;;  %v354_v33 = vmul.u32 9, %v353_v9 }
 0x174   : > { %v1731_v10 = vpop.f32.mrb[11].mxu1  ;;  %vm2381_vm13 = vcmp.lt.s32.totalorder %v397_v51, 8 }
 0x175   : > { %v398_v10 = vsel %vm2353_vm9, %v389_v60, %v311_v40  ;;  %v1588_v40 = vsel %vm2381_vm13, 1.0, %v1911_v0  ;;  %vm1356_vm13 = vcmask 57344  }
 0x176   : > { %vm2401_vm0 = vcmp.lt.s32.totalorder %v398_v10, 8 }
 0x177   : > { %v2434_v53 = vsel %vm2401_vm0, 1.0, %v1911_v0 }
 0x179   : > { %v2295_v15 = vpop.f32.mrb[12].mxu1 }
 0x17a   : > { %v1734_v24 = vpop.f32.mrb[13].mxu1 }
 0x17b   : > { %v2302_v26 = vpop.f32.mrb[14].mxu1 }
 0x17c   : > { %v1735_v6 = vpop.f32.mrb[15].mxu1 }
 0x17d   : > { %v391_v6 = vadd.s32 9, %v2365_v18 }
 0x185   : > { %v2327_v48 = vpop.f32.mrb[16].mxu1 }
 0x186   : > { %v1738_v32 = vpop.f32.mrb[17].mxu1 }
 0x187   : > { %v826_v56 = vpop.f32.mrb[18].mxu1 }
 0x188   : > { %v1739_v58 = vpop.f32.mrb[19].mxu1 }
 0x18d   : > { %v1268_v11 = vpop.f32.mrb[20].mxu1 }
 0x18e   : > { %1315 = vst.msk [vmem:[%s2371_s12] sm:$0xff] %vm571_vm5, %v1268_v11  ;;  %v1391_v21 = vmul.f32 %v1585_v5, %v1268_v11  ;;  %v1167_v23 = vpop.f32.mrb[0].mxu0  ;;  %v1788_v24 = vpop.f32.mrb[21].mxu1 }
 0x18f   : > { %v1806_v25 = vadd.f32 %v1167_v23, %v2250_v46  ;;  %v1766_v8 = vpop.f32.mrb[1].mxu0  ;;  %v1271_v13 = vpop.f32.mrb[22].mxu1  ;;  %v2463_v24 = vsub.s32 %v2325_v27, %v354_v33 }
 0x190   : > { %v1400_v31 = vsel %vm571_vm5, %v1391_v21, 0.0  ;;  %v1424_v34 = vmul.f32 %v1391_v21, %v1268_v11  ;;  %1316 = vst.msk [vmem:[%s2371_s12 + $0x8] sm:$0xff] %vm571_vm5, %v1271_v13  ;;  %v1392_v37 = vmul.f32 %v1586_v16, %v1271_v13  ;;  %v1170_v36 = vpop.f32.mrb[2].mxu0  ;;  %v1789_v46 = vpop.f32.mrb[23].mxu1 }
 0x191   : > { %1306 = vst.msk [vmem:[%s2393_s15] sm:$0xff] %vm571_vm5, %v1806_v25  ;;  %v1324_v39 = vmul.f32 %v1806_v25, %v1585_v5  ;;  %v1807_v14 = vadd.f32 %v1170_v36, %v2252_v20  ;;  %v1767_v38 = vpop.f32.mrb[3].mxu0  ;;  %v2427_v20 = vsub.s32 %v2307_v35, %v343_v28  ;;  %v400_v35 = vsel %vm2420_vm2, %v391_v6, %v2365_v18 }
 0x192   : > { %v1433_v43 = vsel %vm571_vm5, %v1424_v34, 0.0  ;;  %v1401_v44 = vsel %vm571_vm5, %v1392_v37, 0.0  ;;  %v1425_v59 = vmul.f32 %v1392_v37, %v1271_v13  ;;  %vm2452_vm6 = vcmp.lt.s32.totalorder %v400_v35, 8 }
 0x193   : > { %v1358_v45 = vmul.f32 %v1806_v25, %v1324_v39  ;;  %v1402_v12 = vadd.f32 %v1401_v44, %v1400_v31  ;;  %1307 = vst.msk [vmem:[%s2393_s15 + $0x8] sm:$0xff] %vm571_vm5, %v1807_v14  ;;  %v1325_v52 = vmul.f32 %v1807_v14, %v1586_v16  ;;  %v1333_v55 = vsel %vm571_vm5, %v1324_v39, 0.0 }
 0x194   : > { %v1434_v32 = vsel %vm571_vm5, %v1425_v59, 0.0  ;;  %vm365_vm3 = vcmp.ne.s32.totalorder %v2427_v20, 0  ;;  %vm374_vm4 = vcmp.lt.s32.totalorder %v2427_v20, 0  ;;  %v392_v13 = vadd.s32 9, %v2427_v20 }
 0x195   : > { %v1435_v56 = vadd.f32 %v1434_v32, %v1433_v43  ;;  %v1334_v49 = vsel %vm571_vm5, %v1325_v52, 0.0  ;;  %v1359_v57 = vmul.f32 %v1807_v14, %v1325_v52  ;;  %v1276_v58 = vpop.f32.mrb[24].mxu1  ;;  %v1367_v1 = vsel %vm571_vm5, %v1358_v45, 0.0  ;;  %vm2481_vm7 = vmand %vm374_vm4, %vm365_vm3 }
 0x196   : > { %v1335_v60 = vadd.f32 %v1334_v49, %v1333_v55  ;;  %1317 = vst.msk [vmem:[%s2371_s12 + $0x10] sm:$0xff] %vm571_vm5, %v1276_v58  ;;  %v1393_v42 = vmul.f32 %v1587_v29, %v1276_v58  ;;  %v1175_v62 = vpop.f32.mrb[4].mxu0  ;;  %v1792_v63 = vpop.f32.mrb[25].mxu1  ;;  %v2475_v37 = vsel %vm2452_vm6, 1.0, %v1911_v0  ;;  %vm366_vm8 = vcmp.ne.s32.totalorder %v2463_v24, 0 }
 0x197   : > { %v1368_v2 = vsel %vm571_vm5, %v1359_v57, 0.0  ;;  %v1808_v51 = vadd.f32 %v1175_v62, %v2256_v50  ;;  %v1770_v61 = vpop.f32.mrb[5].mxu0  ;;  %v1279_v18 = vpop.f32.mrb[26].mxu1  ;;  %vm375_vm9 = vcmp.lt.s32.totalorder %v2463_v24, 0  ;;  %v401_v32 = vsel %vm2481_vm7, %v392_v13, %v2427_v20 }
 0x198   : > { %v1369_v5 = vadd.f32 %v1368_v2, %v1367_v1  ;;  %v1403_v7 = vsel %vm571_vm5, %v1393_v42, 0.0  ;;  %v1426_v10 = vmul.f32 %v1393_v42, %v1276_v58  ;;  %1318 = vst.msk [vmem:[%s2371_s12 + $0x18] sm:$0xff] %vm571_vm5, %v1279_v18  ;;  %v1394_v11 = vmul.f32 %v1588_v40, %v1279_v18  ;;  %v1178_v16 = vpop.f32.mrb[6].mxu0  ;;  %v1793_v17 = vpop.f32.mrb[27].mxu1  ;;  %vm2510_vm10 = vmand %vm375_vm9, %vm366_vm8 }
 0x199   : > { %v1404_v19 = vadd.f32 %v1403_v7, %v1402_v12  ;;  %1308 = vst.msk [vmem:[%s2393_s15 + $0x10] sm:$0xff] %vm571_vm5, %v1808_v51  ;;  %v1326_v50 = vmul.f32 %v1808_v51, %v1587_v29  ;;  %v1809_v21 = vadd.f32 %v1178_v16, %v2259_v54  ;;  %v1771_v23 = vpop.f32.mrb[7].mxu0  ;;  %v393_v35 = vadd.s32 9, %v2463_v24 }
 0x19a   : > { %v1436_v28 = vsel %vm571_vm5, %v1426_v10, 0.0  ;;  %v1405_v25 = vsel %vm571_vm5, %v1394_v11, 0.0  ;;  %v1427_v8 = vmul.f32 %v1394_v11, %v1279_v18  ;;  %vm410_vm11 = vcmp.lt.s32.totalorder %v401_v32, 8 }
 0x19b   : > { %v1437_v30 = vadd.f32 %v1436_v28, %v1435_v56  ;;  %v1336_v6 = vsel %vm571_vm5, %v1326_v50, 0.0  ;;  %v1360_v31 = vmul.f32 %v1808_v51, %v1326_v50  ;;  %v1406_v34 = vadd.f32 %v1405_v25, %v1404_v19  ;;  %1309 = vst.msk [vmem:[%s2393_s15 + $0x18] sm:$0xff] %vm571_vm5, %v1809_v21 }
 0x19c   : > { %v1337_v54 = vadd.f32 %v1336_v6, %v1335_v60  ;;  %v1438_v29 = vsel %vm571_vm5, %v1427_v8, 0.0  ;;  %v1327_v27 = vmul.f32 %v1809_v21, %v1588_v40  ;;  %v402_v10 = vsel %vm2510_vm10, %v393_v35, %v2463_v24 }
 0x19d   : > { %v1370_v46 = vsel %vm571_vm5, %v1360_v31, 0.0  ;;  %v1439_v9 = vadd.f32 %v1438_v29, %v1437_v30  ;;  %v1284_v39 = vpop.f32.mrb[28].mxu1  ;;  %v1592_v19 = vsel %vm410_vm11, 1.0, %v1911_v0  ;;  %vm2531_vm12 = vcmp.lt.s32.totalorder %v402_v10, 8 }
 0x19e   : > { %v1371_v14 = vadd.f32 %v1370_v46, %v1369_v5  ;;  %v1338_v38 = vsel %vm571_vm5, %v1327_v27, 0.0  ;;  %v1361_v40 = vmul.f32 %v1809_v21, %v1327_v27  ;;  %1319 = vst.msk [vmem:[%s2371_s12 + $0x20] sm:$0xff] %vm571_vm5, %v1284_v39  ;;  %v1395_v47 = vmul.f32 %v2434_v53, %v1284_v39  ;;  %v1183_v43 = vpop.f32.mrb[8].mxu0  ;;  %v1796_v44 = vpop.f32.mrb[29].mxu1 }
 0x19f   : > { %v1339_v59 = vadd.f32 %v1338_v38, %v1337_v54  ;;  %v1810_v45 = vadd.f32 %v1183_v43, %v2278_v3  ;;  %v1774_v12 = vpop.f32.mrb[9].mxu0  ;;  %v1287_v52 = vpop.f32.mrb[30].mxu1  ;;  %v1593_v43 = vsel %vm2531_vm12, 1.0, %v1911_v0 }
 0x1a0   : > { %v1372_v33 = vsel %vm571_vm5, %v1361_v40, 0.0  ;;  %v1407_v55 = vsel %vm571_vm5, %v1395_v47, 0.0  ;;  %v1428_v56 = vmul.f32 %v1395_v47, %v1284_v39  ;;  %1320 = vst.msk [vmem:[%s2371_s12 + $0x28] sm:$0xff] %vm571_vm5, %v1287_v52  ;;  %v1396_v49 = vmul.f32 %v2438_v41, %v1287_v52  ;;  %v1186_v57 = vpop.f32.mrb[10].mxu0  ;;  %v1797_v58 = vpop.f32.mrb[31].mxu1 }
 0x1a1   : > { %v1373_v3 = vadd.f32 %v1372_v33, %v1371_v14  ;;  %v1408_v60 = vadd.f32 %v1407_v55, %v1406_v34  ;;  %1310 = vst.msk [vmem:[%s2393_s15 + $0x20] sm:$0xff] %vm571_vm5, %v1810_v45  ;;  %v1328_v20 = vmul.f32 %v1810_v45, %v2434_v53  ;;  %v1811_v42 = vadd.f32 %v1186_v57, %v2283_v22  ;;  %v1775_v62 = vpop.f32.mrb[11].mxu0 }
 0x1a2   : > { %v1440_v1 = vsel %vm571_vm5, %v1428_v56, 0.0  ;;  %v1409_v2 = vsel %vm571_vm5, %v1396_v49, 0.0  ;;  %v1429_v51 = vmul.f32 %v1396_v49, %v1287_v52 }
 0x1a3   : > { %v1441_v61 = vadd.f32 %v1440_v1, %v1439_v9  ;;  %v1340_v53 = vsel %vm571_vm5, %v1328_v20, 0.0  ;;  %v1362_v22 = vmul.f32 %v1810_v45, %v1328_v20  ;;  %v1410_v18 = vadd.f32 %v1409_v2, %v1408_v60  ;;  %1311 = vst.msk [vmem:[%s2393_s15 + $0x28] sm:$0xff] %vm571_vm5, %v1811_v42 }
 0x1a4   : > { %v1341_v4 = vadd.f32 %v1340_v53, %v1339_v59  ;;  %v1442_v5 = vsel %vm571_vm5, %v1429_v51, 0.0  ;;  %v1329_v7 = vmul.f32 %v1811_v42, %v2438_v41 }
 0x1a5   : > { %v1374_v11 = vsel %vm571_vm5, %v1362_v22, 0.0  ;;  %v1443_v16 = vadd.f32 %v1442_v5, %v1441_v61  ;;  %v1292_v17 = vpop.f32.mrb[32].mxu1 }
 0x1a6   : > { %v1375_v50 = vadd.f32 %v1374_v11, %v1373_v3  ;;  %v1342_v21 = vsel %vm571_vm5, %v1329_v7, 0.0  ;;  %v1363_v23 = vmul.f32 %v1811_v42, %v1329_v7  ;;  %1321 = vst.msk [vmem:[%s2371_s12 + $0x30] sm:$0xff] %vm571_vm5, %v1292_v17  ;;  %v1397_v28 = vmul.f32 %v2475_v37, %v1292_v17  ;;  %v1191_v41 = vpop.f32.mrb[12].mxu0  ;;  %v1800_v25 = vpop.f32.mrb[33].mxu1 }
 0x1a7   : > { %v1343_v8 = vadd.f32 %v1342_v21, %v1341_v4  ;;  %v1812_v24 = vadd.f32 %v1191_v41, %v2295_v15  ;;  %v1778_v13 = vpop.f32.mrb[13].mxu0  ;;  %v1295_v30 = vpop.f32.mrb[34].mxu1 }
 0x1a8   : > { %v1376_v31 = vsel %vm571_vm5, %v1363_v23, 0.0  ;;  %v1411_v34 = vsel %vm571_vm5, %v1397_v28, 0.0  ;;  %v1430_v54 = vmul.f32 %v1397_v28, %v1292_v17  ;;  %1322 = vst.msk [vmem:[%s2371_s12 + $0x38] sm:$0xff] %vm571_vm5, %v1295_v30  ;;  %v1398_v29 = vmul.f32 %v1592_v19, %v1295_v30  ;;  %v1194_v27 = vpop.f32.mrb[14].mxu0  ;;  %v1801_v36 = vpop.f32.mrb[35].mxu1 }
 0x1a9   : > { %v1377_v46 = vadd.f32 %v1376_v31, %v1375_v50  ;;  %v1412_v9 = vadd.f32 %v1411_v34, %v1410_v18  ;;  %1312 = vst.msk [vmem:[%s2393_s15 + $0x30] sm:$0xff] %vm571_vm5, %v1812_v24  ;;  %v1330_v15 = vmul.f32 %v1812_v24, %v2475_v37  ;;  %v1813_v39 = vadd.f32 %v1194_v27, %v2302_v26  ;;  %v1779_v14 = vpop.f32.mrb[15].mxu0 }
 0x1aa   : > { %v1444_v38 = vsel %vm571_vm5, %v1430_v54, 0.0  ;;  %v1413_v40 = vsel %vm571_vm5, %v1398_v29, 0.0  ;;  %v1431_v47 = vmul.f32 %v1398_v29, %v1295_v30 }
 0x1ab   : > { %v1445_v44 = vadd.f32 %v1444_v38, %v1443_v16  ;;  %v1344_v59 = vsel %vm571_vm5, %v1330_v15, 0.0  ;;  %v1364_v45 = vmul.f32 %v1812_v24, %v1330_v15  ;;  %v1414_v12 = vadd.f32 %v1413_v40, %v1412_v9  ;;  %1313 = vst.msk [vmem:[%s2393_s15 + $0x38] sm:$0xff] %vm571_vm5, %v1813_v39 }
 0x1ac   : > { %v1345_v37 = vadd.f32 %v1344_v59, %v1343_v8  ;;  %v1446_v26 = vsel %vm571_vm5, %v1431_v47, 0.0  ;;  %v1331_v52 = vmul.f32 %v1813_v39, %v1592_v19 }
 0x1ad   : > { %v1378_v32 = vsel %vm571_vm5, %v1364_v45, 0.0  ;;  %v1447_v35 = vadd.f32 %v1446_v26, %v1445_v44  ;;  %v1300_v33 = vpop.f32.mrb[36].mxu1 }
 0x1ae   : > { %v1379_v55 = vadd.f32 %v1378_v32, %v1377_v46  ;;  %v1346_v56 = vsel %vm571_vm5, %v1331_v52, 0.0  ;;  %v1365_v49 = vmul.f32 %v1813_v39, %v1331_v52  ;;  %1323 = vst.msk [vmem:[%s2371_s12 + $0x40] sm:$0xff] %vm571_vm5, %v1300_v33  ;;  %v1399_v0 = vmul.f32 %v1593_v43, %v1300_v33  ;;  %v1199_v57 = vpop.f32.mrb[16].mxu0  ;;  %v1804_v58 = vpop.f32.mrb[37].mxu1 }
 0x1af   : > { %v1347_v3 = vadd.f32 %v1346_v56, %v1345_v37  ;;  %v1814_v60 = vadd.f32 %v1199_v57, %v2327_v48  ;;  %v1782_v20 = vpop.f32.mrb[17].mxu0  ;;  %v1303_v42 = vpop.f32.mrb[38].mxu1 }
 0x1b0   : > { %v1380_v62 = vsel %vm571_vm5, %v1365_v49, 0.0  ;;  %v1415_v63 = vsel %vm571_vm5, %v1399_v0, 0.0  ;;  %v1432_v1 = vmul.f32 %v1399_v0, %v1300_v33  ;;  %v1202_v2 = vpop.f32.mrb[18].mxu0  ;;  %v1805_v51 = vpop.f32.mrb[39].mxu1 }
 0x1b1   : > { %v1381_v61 = vadd.f32 %v1380_v62, %v1379_v55  ;;  %v1416_v53 = vadd.f32 %v1415_v63, %v1414_v12  ;;  %1314 = vst.msk [vmem:[%s2393_s15 + $0x40] sm:$0xff] %vm571_vm5, %v1814_v60  ;;  %v1332_v22 = vmul.f32 %v1814_v60, %v1593_v43  ;;  %v1783_v18 = vpop.f32.mrb[19].mxu0 }
 0x1b2   : > { %v1448_v4 = vsel %vm571_vm5, %v1432_v1, 0.0 }
 0x1b3   : > { %v1417_v5 = vrot.slane %v1416_v53, 4  ;;  %v1449_v48 = vadd.f32 %v1448_v4, %v1447_v35  ;;  %v1348_v7 = vsel %vm571_vm5, %v1332_v22, 0.0  ;;  %v1366_v10 = vmul.f32 %v1814_v60, %v1332_v22 }
 0x1b4   : > { %v1349_v11 = vadd.f32 %v1348_v7, %v1347_v3 }
 0x1b5   : > { %v1418_v16 = vadd.f32 %v1417_v5, %v1416_v53  ;;  %v1450_v17 = vrot.slane %v1449_v48, 4  ;;  %v1382_v19 = vsel %vm571_vm5, %v1366_v10, 0.0 }
 0x1b6   : > { %v1350_v50 = vrot.slane %v1349_v11, 4  ;;  %v1383_v21 = vadd.f32 %v1382_v19, %v1381_v61 }
 0x1b7   : > { %v1419_v23 = vrot.slane %v1418_v16, 2  ;;  %v1451_v28 = vadd.f32 %v1450_v17, %v1449_v48 }
 0x1b8   : > { %v1351_v41 = vadd.f32 %v1350_v50, %v1349_v11  ;;  %v1384_v25 = vrot.slane %v1383_v21, 4 }
 0x1b9   : > { %v1420_v8 = vadd.f32 %v1419_v23, %v1418_v16  ;;  %v1452_v24 = vrot.slane %v1451_v28, 2 }
 0x1ba   : > { %v1352_v13 = vrot.slane %v1351_v41, 2  ;;  %v1385_v30 = vadd.f32 %v1384_v25, %v1383_v21 }
 0x1bb   : > { %v1421_v6 = vrot.slane %v1420_v8, 1  ;;  %v1453_v31 = vadd.f32 %v1452_v24, %v1451_v28 }
 0x1bc   : > { %v1353_v34 = vadd.f32 %v1352_v13, %v1351_v41  ;;  %v1386_v54 = vrot.slane %v1385_v30, 2 }
 0x1bd   : > { %v1422_v29 = vadd.f32 %v1421_v6, %v1420_v8  ;;  %v1454_v27 = vrot.slane %v1453_v31, 1 }
 0x1be   : > { %v1354_v36 = vrot.slane %v1353_v34, 1  ;;  %v1387_v46 = vadd.f32 %v1386_v54, %v1385_v30 }
 0x1bf   : > { %1423 = vst.msk [vmem:[%s247_s21 + $0x2] sm:$0x1] %vm1356_vm13, %v1422_v29  ;;  %v1455_v9 = vadd.f32 %v1454_v27, %v1453_v31 }
 0x1c0   : > { %v1355_v15 = vadd.f32 %v1354_v36, %v1353_v34  ;;  %v1388_v39 = vrot.slane %v1387_v46, 1 }
 0x1c1   : > { %1456 = vst.msk [vmem:[%s247_s21 + $0x3] sm:$0x1] %vm1356_vm13, %v1455_v9 }
 0x1c2   : > { %1357 = vst.msk [vmem:[%s247_s21] sm:$0x1] %vm1356_vm13, %v1355_v15  ;;  %v1389_v14 = vadd.f32 %v1388_v39, %v1387_v46 }
 0x1c4   : > { %1390 = vst.msk [vmem:[%s247_s21 + $0x1] sm:$0x1] %vm1356_vm13, %v1389_v14 }
 0x1c5 PF: > { %s16_s18 = sadd.s32 1, %s1909_s18  }
 0x1c6   : > { %p13_p4 = scmp.ge.s32.totalorder %s16_s18, 4  }
 0x1c8   :  { %15 = sbr.rel (!%p13_p4) target bundleno = 1 (0x1), region = 91 }

</bundles_post_ra>
